<compile_context>
chip_gen: v7x
topology: tpu7x:2x2x1
jax: 0.10.0
libtpu: 0.0.40
codegen_flags: <defaults>
</compile_context>

<pallas_src>
import functools

import jax
import jax.numpy as jnp
from jax.experimental import pallas as pl
from jax.experimental.pallas import tpu as pltpu


def critic_kernel(x_ref, w1_ref, b1_ref, w2_ref, b2_ref, w3_ref, b3_ref, o_ref):
    """One (tm batch-tile) grid step: full 3-layer MLP critic, straight-line."""
    # fc1: cast the f32 x tile to bf16 right at the MXU input (VPU cast is
    # hidden under the x DMA); f32 accumulation.  K is the full ragged
    # state_dim (block == full array dim), Mosaic handles the lane padding.
    xb = x_ref[...].astype(jnp.bfloat16)
    h = jnp.dot(xb, w1_ref[...], preferred_element_type=jnp.float32)
    h = jnp.maximum(h + b1_ref[...], 0.0)

    # fc2: bf16 operands on the MXU, f32 accumulation, f32 bias + ReLU.
    h = jnp.dot(h.astype(jnp.bfloat16), w2_ref[...],
                preferred_element_type=jnp.float32)
    h = jnp.maximum(h + b2_ref[...], 0.0)

    # fc3 (value head, N=1): VPU multiply + XLU row-reduce instead of a
    # nearly empty MXU pass; store stays a simple (tm, 1) write.
    w3_row = w3_ref[...].astype(jnp.float32)                 # (1, hidden)
    v = jnp.sum(h * w3_row, axis=-1, keepdims=True) + b3_ref[...]
    o_ref[...] = v.astype(o_ref.dtype)


def prepare_params(w1, b1, w2, b2, w3, b3):
    """One-time parameter prep (do once, reuse across forward calls):
       * weights stored bf16 (halves HBM bytes of the dominant fc1 load),
       * fc3 weight reshaped to a (1, hidden) row for the reduction head,
       * biases kept f32.  No K padding needed (kernel uses the full ragged K)."""
    # CriticNet is a value head: action_dim == 1 (module default).
    assert w3.shape[1] == 1, "reduction head specialized to action_dim == 1"
    state_dim, hidden = w1.shape
    return (w1.astype(jnp.bfloat16),
            b1.reshape(1, hidden).astype(jnp.float32),
            w2.astype(jnp.bfloat16),
            b2.reshape(1, hidden).astype(jnp.float32),
            w3.reshape(1, hidden).astype(jnp.bfloat16),
            b3.reshape(1, 1).astype(jnp.float32))


@functools.partial(jax.jit, static_argnames=("tm",))
def critic_forward(x, params, *, tm=128):
    # tm=128 keeps >=2 batch blocks at batch>=256 so v7x megacore sharding
    # engages; on single-TC v5e/v6e feel free to pass tm=256..512.
    w1p, b1, w2p, b2, w3p, b3 = params
    batch, state_dim = x.shape
    k_dim, hidden = w1p.shape
    assert k_dim == state_dim

    # bf16 sublane packing -> round the batch tile to a multiple of 16.
    tm = pl.cdiv(tm, 16) * 16
    tm = max(16, min(tm, pl.cdiv(batch, 16) * 16))
    b_pad = pl.cdiv(batch, tm) * tm
    if b_pad != batch:
        x = jnp.pad(x, ((0, b_pad - batch), (0, 0)))

    grid = (b_pad // tm,)

    flops = 2 * b_pad * (state_dim * hidden + hidden * hidden + hidden)
    bytes_accessed = (x.size * 4 + w1p.size * 2 + w2p.size * 2 + w3p.size * 2
                      + (b1.size + b2.size + b3.size) * 4 + b_pad * 4)

    out = pl.pallas_call(
        critic_kernel,
        out_shape=jax.ShapeDtypeStruct((b_pad, 1), jnp.float32),
        grid_spec=pltpu.PrefetchScalarGridSpec(
            num_scalar_prefetch=0,
            grid=grid,
            in_specs=[
                pl.BlockSpec((tm, state_dim), lambda i: (i, 0)),      # x tile (f32)
                pl.BlockSpec((state_dim, hidden), lambda i: (0, 0)),  # w1 (resident)
                pl.BlockSpec((1, hidden), lambda i: (0, 0)),          # b1
                pl.BlockSpec((hidden, hidden), lambda i: (0, 0)),     # w2 (resident)
                pl.BlockSpec((1, hidden), lambda i: (0, 0)),          # b2
                pl.BlockSpec((1, hidden), lambda i: (0, 0)),          # w3 row
                pl.BlockSpec((1, 1), lambda i: (0, 0)),               # b3
            ],
            out_specs=pl.BlockSpec((tm, 1), lambda i: (i, 0)),
        ),
        compiler_params=pltpu.CompilerParams(
            dimension_semantics=("parallel",),
            vmem_limit_bytes=32 * 1024 * 1024,
        ),
        cost_estimate=pl.CostEstimate(
            flops=flops, transcendentals=0, bytes_accessed=bytes_accessed),
    )(x, w1p, b1, w2p, b2, w3p, b3)

    return out[:batch]


def init_params(key, state_dim, hidden_dim, action_dim):
    # Deterministic init mimicking nn.Linear's uniform(-1/sqrt(fan_in), 1/sqrt(fan_in)).
    ks = jax.random.split(key, 6)

    def lin(kw, kb, fan_in, fan_out):
        bound = 1.0 / jnp.sqrt(jnp.float32(fan_in))
        w = jax.random.uniform(kw, (fan_in, fan_out), jnp.float32, -bound, bound)
        b = jax.random.uniform(kb, (1, fan_out), jnp.float32, -bound, bound)
        return w, b

    w1, b1 = lin(ks[0], ks[1], state_dim, hidden_dim)
    w2, b2 = lin(ks[2], ks[3], hidden_dim, hidden_dim)
    w3, b3 = lin(ks[4], ks[5], hidden_dim, action_dim)
    return w1, b1, w2, b2, w3, b3


if __name__ == "__main__":
    # Module-default feature dims; small demo batch (multiple of 16).
    batch = 16
    state_dim = 3049   # CriticNet default state_dim (ragged K handled in-kernel)
    hidden_dim = 256
    action_dim = 1

    key = jax.random.PRNGKey(0)
    k_x, k_p = jax.random.split(key)
    x = jax.random.normal(k_x, (batch, state_dim), dtype=jnp.float32)
    w1, b1, w2, b2, w3, b3 = init_params(k_p, state_dim, hidden_dim, action_dim)

    params = prepare_params(w1, b1, w2, b2, w3, b3)

    value = critic_forward(x, params, tm=128)
    value = jax.block_until_ready(value)
    assert value.shape == (batch, action_dim)
    assert value.dtype == jnp.float32

    # Reference 1: mirrors the kernel's precision choices (bf16 operands,
    # f32 accumulation) -> tight tolerance; validates the kernel itself.
    xb = x.astype(jnp.bfloat16)
    w1b, w2b = w1.astype(jnp.bfloat16), w2.astype(jnp.bfloat16)
    w3b = w3.astype(jnp.bfloat16).astype(jnp.float32)
    h = jnp.maximum(jnp.dot(xb, w1b, preferred_element_type=jnp.float32) + b1, 0.0)
    h = jnp.maximum(jnp.dot(h.astype(jnp.bfloat16), w2b,
                            preferred_element_type=jnp.float32) + b2, 0.0)
    ref_bf16 = h @ w3b + b3
    assert jnp.allclose(value, ref_bf16, atol=5e-3, rtol=5e-3)

    # Reference 2: original f32 module semantics -> loose tolerance (the bf16
    # weight/activation operands are the intended quantization from the perf review).
    h = jnp.maximum(x @ w1 + b1, 0.0)
    h = jnp.maximum(h @ w2 + b2, 0.0)
    ref_f32 = h @ w3 + b3
    assert jnp.allclose(value, ref_f32, atol=3e-2, rtol=3e-2)

    print("KERNEL_OK")
</pallas_src>

<mosaic_0001>
module attributes {stable_mosaic.version = 11 : i64} {
  func.func @critic_kernel(%arg0: i32, %arg1: memref<16x3049xf32, #tpu.memory_space<vmem>>, %arg2: memref<3049x256xbf16, #tpu.memory_space<vmem>>, %arg3: memref<1x256xf32, #tpu.memory_space<vmem>>, %arg4: memref<256x256xbf16, #tpu.memory_space<vmem>>, %arg5: memref<1x256xf32, #tpu.memory_space<vmem>>, %arg6: memref<1x256xbf16, #tpu.memory_space<vmem>>, %arg7: memref<1x1xf32, #tpu.memory_space<vmem>>, %arg8: memref<16x1xf32, #tpu.memory_space<vmem>>) attributes {dimension_semantics = [#tpu.dimension_semantics<parallel>], iteration_bounds = array<i64: 1>, scalar_prefetch = 0 : i64, scratch_operands = 0 : i64, tpu.core_type = #tpu.core_type<tc>, window_params = [{transform_indices = @transform_0, window_bounds = array<i64: 16, 3049>}, {pipeline_mode = #tpu.pipeline_mode<synchronous>, transform_indices = @transform_1, window_bounds = array<i64: 3049, 256>}, {pipeline_mode = #tpu.pipeline_mode<synchronous>, transform_indices = @transform_2, window_bounds = array<i64: 1, 256>}, {pipeline_mode = #tpu.pipeline_mode<synchronous>, transform_indices = @transform_3, window_bounds = array<i64: 256, 256>}, {pipeline_mode = #tpu.pipeline_mode<synchronous>, transform_indices = @transform_4, window_bounds = array<i64: 1, 256>}, {pipeline_mode = #tpu.pipeline_mode<synchronous>, transform_indices = @transform_5, window_bounds = array<i64: 1, 256>}, {pipeline_mode = #tpu.pipeline_mode<synchronous>, transform_indices = @transform_6, window_bounds = array<i64: 1, 1>}, {transform_indices = @transform_7, window_bounds = array<i64: 16, 1>}]} {
    %c0 = arith.constant 0 : index
    %c0_0 = arith.constant 0 : index
    %0 = vector.load %arg1[%c0, %c0_0] : memref<16x3049xf32, #tpu.memory_space<vmem>>, vector<16x3049xf32>
    %1 = arith.truncf %0 : vector<16x3049xf32> to vector<16x3049xbf16>
    %c0_1 = arith.constant 0 : index
    %c0_2 = arith.constant 0 : index
    %2 = vector.load %arg2[%c0_1, %c0_2] : memref<3049x256xbf16, #tpu.memory_space<vmem>>, vector<3049x256xbf16>
    %cst = arith.constant dense<0.000000e+00> : vector<16x256xf32>
    %3 = tpu.matmul %1, %2, %cst {dimension_numbers = #tpu.dot_dimension_numbers<[1], [0], [0], [1], [0, 0, 1, 1], [], []>} : vector<16x3049xbf16>, vector<3049x256xbf16>, vector<16x256xf32> -> vector<16x256xf32>
    %c0_3 = arith.constant 0 : index
    %c0_4 = arith.constant 0 : index
    %4 = vector.load %arg3[%c0_3, %c0_4] : memref<1x256xf32, #tpu.memory_space<vmem>>, vector<1x256xf32>
    %5 = vector.broadcast %4 : vector<1x256xf32> to vector<16x256xf32>
    %6 = arith.addf %3, %5 : vector<16x256xf32>
    %cst_5 = arith.constant 0.000000e+00 : f32
    %7 = vector.broadcast %cst_5 : f32 to vector<16x256xf32>
    %8 = arith.maximumf %6, %7 : vector<16x256xf32>
    %9 = arith.truncf %8 : vector<16x256xf32> to vector<16x256xbf16>
    %c0_6 = arith.constant 0 : index
    %c0_7 = arith.constant 0 : index
    %10 = vector.load %arg4[%c0_6, %c0_7] : memref<256x256xbf16, #tpu.memory_space<vmem>>, vector<256x256xbf16>
    %cst_8 = arith.constant dense<0.000000e+00> : vector<16x256xf32>
    %11 = tpu.matmul %9, %10, %cst_8 {dimension_numbers = #tpu.dot_dimension_numbers<[1], [0], [0], [1], [0, 0, 1, 1], [], []>} : vector<16x256xbf16>, vector<256x256xbf16>, vector<16x256xf32> -> vector<16x256xf32>
    %c0_9 = arith.constant 0 : index
    %c0_10 = arith.constant 0 : index
    %12 = vector.load %arg5[%c0_9, %c0_10] : memref<1x256xf32, #tpu.memory_space<vmem>>, vector<1x256xf32>
    %13 = vector.broadcast %12 : vector<1x256xf32> to vector<16x256xf32>
    %14 = arith.addf %11, %13 : vector<16x256xf32>
    %cst_11 = arith.constant 0.000000e+00 : f32
    %15 = vector.broadcast %cst_11 : f32 to vector<16x256xf32>
    %16 = arith.maximumf %14, %15 : vector<16x256xf32>
    %c0_12 = arith.constant 0 : index
    %c0_13 = arith.constant 0 : index
    %17 = vector.load %arg6[%c0_12, %c0_13] : memref<1x256xbf16, #tpu.memory_space<vmem>>, vector<1x256xbf16>
    %18 = arith.extf %17 : vector<1x256xbf16> to vector<1x256xf32>
    %19 = vector.broadcast %18 : vector<1x256xf32> to vector<16x256xf32>
    %20 = arith.mulf %16, %19 : vector<16x256xf32>
    %cst_14 = arith.constant dense<0.000000e+00> : vector<16xf32>
    %21 = vector.multi_reduction <add>, %20, %cst_14 [1] : vector<16x256xf32> to vector<16xf32>
    %22 = vector.shape_cast %21 : vector<16xf32> to vector<16x1xf32>
    %c0_15 = arith.constant 0 : index
    %c0_16 = arith.constant 0 : index
    %23 = vector.load %arg7[%c0_15, %c0_16] : memref<1x1xf32, #tpu.memory_space<vmem>>, vector<1x1xf32>
    %24 = vector.broadcast %23 : vector<1x1xf32> to vector<16x1xf32>
    %25 = arith.addf %22, %24 : vector<16x1xf32>
    %c0_17 = arith.constant 0 : index
    %c0_18 = arith.constant 0 : index
    %26 = vector.load %arg8[%c0_17, %c0_18] : memref<16x1xf32, #tpu.memory_space<vmem>>, vector<16x1xf32>
    tpu.vector_store %arg8[%c0_17, %c0_18], %25 {strides = array<i32>} : memref<16x1xf32, #tpu.memory_space<vmem>>, vector<16x1xf32>,
    return
  }
  func.func @transform_0(%arg0: i32) -> (i32, i32) {
    %c0_i32 = arith.constant 0 : i32
    %c0_i32_0 = arith.constant 0 : i32
    return %arg0, %c0_i32 : i32, i32
  }
  func.func @transform_1(%arg0: i32) -> (i32, i32) {
    %c0_i32 = arith.constant 0 : i32
    %c0_i32_0 = arith.constant 0 : i32
    %c0_i32_1 = arith.constant 0 : i32
    return %c0_i32, %c0_i32_0 : i32, i32
  }
  func.func @transform_2(%arg0: i32) -> (i32, i32) {
    %c0_i32 = arith.constant 0 : i32
    %c0_i32_0 = arith.constant 0 : i32
    %c0_i32_1 = arith.constant 0 : i32
    return %c0_i32, %c0_i32_0 : i32, i32
  }
  func.func @transform_3(%arg0: i32) -> (i32, i32) {
    %c0_i32 = arith.constant 0 : i32
    %c0_i32_0 = arith.constant 0 : i32
    %c0_i32_1 = arith.constant 0 : i32
    return %c0_i32, %c0_i32_0 : i32, i32
  }
  func.func @transform_4(%arg0: i32) -> (i32, i32) {
    %c0_i32 = arith.constant 0 : i32
    %c0_i32_0 = arith.constant 0 : i32
    %c0_i32_1 = arith.constant 0 : i32
    return %c0_i32, %c0_i32_0 : i32, i32
  }
  func.func @transform_5(%arg0: i32) -> (i32, i32) {
    %c0_i32 = arith.constant 0 : i32
    %c0_i32_0 = arith.constant 0 : i32
    %c0_i32_1 = arith.constant 0 : i32
    return %c0_i32, %c0_i32_0 : i32, i32
  }
  func.func @transform_6(%arg0: i32) -> (i32, i32) {
    %c0_i32 = arith.constant 0 : i32
    %c0_i32_0 = arith.constant 0 : i32
    %c0_i32_1 = arith.constant 0 : i32
    return %c0_i32, %c0_i32_0 : i32, i32
  }
  func.func @transform_7(%arg0: i32) -> (i32, i32) {
    %c0_i32 = arith.constant 0 : i32
    %c0_i32_0 = arith.constant 0 : i32
    return %arg0, %c0_i32 : i32, i32
  }
}

</mosaic_0001>

<bundles_post_ra>
// kernel: critic_forward.1
= control target key start
LH: loop header
LB: loop body
LE: loop exit
PB: predicated region body
PF: predicated region fallthrough
CT: control target
= control target key end

     0   :  { %s4685_s0 = inlined_call_operand.hbm [shape: f32[16,3049], index: 0, kind: input, shape index: {}]   ;;  %s4686_s1 = inlined_call_operand.hbm [shape: bf16[3049,256], index: 1, kind: input, shape index: {}]   ;;  %s4687_s2 = inlined_call_operand.hbm [shape: f32[1,256], index: 2, kind: input, shape index: {}]   ;;  %s4688_s3 = inlined_call_operand.hbm [shape: bf16[256,256], index: 3, kind: input, shape index: {}]   ;;  %s4689_s4 = inlined_call_operand.hbm [shape: f32[1,256], index: 4, kind: input, shape index: {}]   ;;  %s4690_s5 = inlined_call_operand.hbm [shape: bf16[1,256], index: 5, kind: input, shape index: {}]   ;;  %s4691_s6 = inlined_call_operand.<no memory space> [shape: f32[1,1], index: 6, kind: input, shape index: {}]   ;;  %s4692_s7 = inlined_call_operand.vmem [shape: f32[16,1], index: 7, kind: output, shape index: {}]  }
   0x1   :  { %v12_v0 = vstv %s4691_s6 }
   0x2   :  { %13 = vst [vmem:[#allocation2] sm:$0x1] %v12_v0 }
   0x3   :  { %14 = vsyncpa [#allocation4], 0 }
   0x4   :  { %15 = vsyncpa [#allocation6], 0 }
   0x5   :  { %16 = vsyncpa [#allocation9], 0 }
   0x6   :  { %17 = vsyncpa [#allocation12], 0  ;;  %s4553_s26 = smov [#allocation5]   ;;  %s4413_s30 = scalar_lea.hbm %s4686_s1, 48896 }
   0x7   :  { %s35_s27 = sshll.u32 %s4553_s26, 4  ;;  %p4414_p0 = scmp.ne.s32.totalorder %s4686_s1, %s4413_s30  ;;  %s36_s27 = int_to_ptr.vmem [resolvable:$true] %s35_s27 }
   0x8   :  { %p4417_p1 = scmp.lt.u32.totalorder %s4413_s30, %s4686_s1 }
   0xa   :  { %p4419_p2 = pnand %p4417_p1, %p4414_p0 }
   0xc   :  { %4422 = shalt.err (!%p4419_p2)
}
   0xd   :  { %s4423_s6 = scalar_lea.vmem %s36_s27, 48896  ;;  %p4428_p4 = scmp.lt.s32.totalorder %s36_s27, %s36_s27 }
   0xe   :  { %p4424_p3 = scmp.ne.s32.totalorder %s36_s27, %s4423_s6  ;;  %p4429_p5 = scmp.lt.s32.totalorder %s4423_s6, %s4423_s6 }
  0x10   :  { %p4430_p6 = por %p4429_p5, %p4428_p4 }
  0x12   :  { %p4431_p7 = pnand %p4430_p6, %p4424_p3 }
  0x14   :  { %4434 = shalt.err (!%p4431_p7)
}
  0x15   :  { %s4554_s12 = smov 128   ;;  %s4555_s13 = smov 8  }
  0x16   :  { %41 = dma.hbm_to_vmem [thread:$0]  %s4686_s1, 48896, %s36_s27, [#allocation6], %s4554_s12, %s4554_s12, %s4555_s13  }
  0x17   :  { %s4556_s16 = smov [#allocation8]   ;;  %s4557_s18 = smov [#allocation3]  }
  0x18   :  { %s57_s17 = sshll.u32 %s4556_s16, 4  ;;  %s23_s19 = sshll.u32 %s4557_s18, 4  ;;  %s58_s17 = int_to_ptr.vmem [resolvable:$true] %s57_s17  ;;  %s24_s19 = int_to_ptr.vmem [resolvable:$true] %s23_s19 }
  0x19   :  { %s4435_s22 = scalar_lea.hbm %s4688_s3, 4096 }
  0x1a   :  { %p4436_p8 = scmp.ne.s32.totalorder %s4688_s3, %s4435_s22  ;;  %p4439_p9 = scmp.lt.u32.totalorder %s4435_s22, %s4688_s3 }
  0x1c   :  { %p4441_p10 = pnand %p4439_p9, %p4436_p8 }
  0x1e   :  { %4444 = shalt.err (!%p4441_p10)
}
  0x1f   :  { %s4445_s1 = scalar_lea.vmem %s58_s17, 4096  ;;  %p4450_p12 = scmp.lt.s32.totalorder %s58_s17, %s58_s17 }
  0x20   :  { %p4446_p11 = scmp.ne.s32.totalorder %s58_s17, %s4445_s1  ;;  %p4451_p13 = scmp.lt.s32.totalorder %s4445_s1, %s4445_s1 }
  0x22   :  { %p4452_p0 = por %p4451_p13, %p4450_p12 }
  0x24   :  { %p4453_p1 = pnand %p4452_p0, %p4446_p11 }
  0x26   :  { %4456 = shalt.err (!%p4453_p1)
}
  0x27   :  { %63 = dma.hbm_to_vmem [thread:$0]  %s4688_s3, 4096, %s58_s17, [#allocation9], %s4554_s12, %s4554_s12, %s4555_s13  }
  0x28   :  { %s4457_s8 = scalar_lea.hbm %s4685_s0, 6144 }
  0x29   :  { %p4458_p2 = scmp.ne.s32.totalorder %s4685_s0, %s4457_s8  ;;  %p4461_p3 = scmp.lt.u32.totalorder %s4457_s8, %s4685_s0 }
  0x2b   :  { %p4463_p4 = pnand %p4461_p3, %p4458_p2 }
  0x2d   :  { %4466 = shalt.err (!%p4463_p4)
}
  0x2e   :  { %s4467_s14 = scalar_lea.vmem %s24_s19, 6144  ;;  %p4472_p6 = scmp.lt.s32.totalorder %s24_s19, %s24_s19 }
  0x2f   :  { %p4468_p5 = scmp.ne.s32.totalorder %s24_s19, %s4467_s14  ;;  %p4473_p7 = scmp.lt.s32.totalorder %s4467_s14, %s4467_s14 }
  0x31   :  { %p4474_p8 = por %p4473_p7, %p4472_p6 }
  0x33   :  { %p4475_p9 = pnand %p4474_p8, %p4468_p5 }
  0x35   :  { %4478 = shalt.err (!%p4475_p9)
}
  0x36   :  { %s4558_s3 = smov 3072   ;;  %s4559_s12 = smov 192  }
  0x37   :  { %29 = dma.hbm_to_vmem [thread:$0]  %s4685_s0, 6144, %s24_s19, [#allocation4], %s4558_s3, %s4558_s3, %s4559_s12  }
  0x38   :  { %s4560_s16 = smov [#allocation7]   ;;  %s4561_s18 = smov [#allocation10]  }
  0x39   :  { %s48_s17 = sshll.u32 %s4560_s16, 4  ;;  %s70_s20 = sshll.u32 %s4561_s18, 4  ;;  %s49_s17 = int_to_ptr.vmem [resolvable:$true] %s48_s17  ;;  %s71_s20 = int_to_ptr.vmem [resolvable:$true] %s70_s20 }
  0x3a   :  { %s4479_s23 = scalar_lea.hbm %s4687_s2, 32 }
  0x3b   :  { %p4480_p10 = scmp.ne.s32.totalorder %s4687_s2, %s4479_s23  ;;  %p4483_p11 = scmp.lt.u32.totalorder %s4479_s23, %s4687_s2 }
  0x3d   :  { %p4485_p12 = pnand %p4483_p11, %p4480_p10 }
  0x3f   :  { %4488 = shalt.err (!%p4485_p12)
}
  0x40   :  { %s4489_s0 = scalar_lea.vmem %s49_s17, 32  ;;  %p4494_p0 = scmp.lt.s32.totalorder %s49_s17, %s49_s17 }
  0x41   :  { %p4490_p13 = scmp.ne.s32.totalorder %s49_s17, %s4489_s0  ;;  %p4495_p1 = scmp.lt.s32.totalorder %s4489_s0, %s4489_s0 }
  0x43   :  { %p4496_p2 = por %p4495_p1, %p4494_p0 }
  0x45   :  { %p4497_p3 = pnand %p4496_p2, %p4490_p13 }
  0x47   :  { %4500 = shalt.err (!%p4497_p3)
}
  0x48   :  { %51 = dma.hbm_to_vmem [thread:$0]  %s4687_s2, 32, %s49_s17, [#allocation6]  }
  0x49   :  { %s4501_s30 = scalar_lea.hbm %s4689_s4, 32 }
  0x4a   :  { %p4502_p4 = scmp.ne.s32.totalorder %s4689_s4, %s4501_s30  ;;  %p4505_p5 = scmp.lt.u32.totalorder %s4501_s30, %s4689_s4 }
  0x4c   :  { %p4507_p6 = pnand %p4505_p5, %p4502_p4 }
  0x4e   :  { %4510 = shalt.err (!%p4507_p6)
}
  0x4f   :  { %s4511_s6 = scalar_lea.vmem %s71_s20, 32  ;;  %p4516_p8 = scmp.lt.s32.totalorder %s71_s20, %s71_s20 }
  0x50   :  { %p4512_p7 = scmp.ne.s32.totalorder %s71_s20, %s4511_s6  ;;  %p4517_p9 = scmp.lt.s32.totalorder %s4511_s6, %s4511_s6 }
  0x52   :  { %p4518_p10 = por %p4517_p9, %p4516_p8 }
  0x54   :  { %p4519_p11 = pnand %p4518_p10, %p4512_p7 }
  0x56   :  { %4522 = shalt.err (!%p4519_p11)
}
  0x57   :  { %73 = dma.hbm_to_vmem [thread:$0]  %s4689_s4, 32, %s71_s20, [#allocation9]  }
  0x58   :  { %s4562_s3 = smov [#allocation11]   ;;  %s4523_s16 = scalar_lea.hbm %s4690_s5, 32 }
  0x59   :  { %s80_s12 = sshll.u32 %s4562_s3, 4  ;;  %p4524_p12 = scmp.ne.s32.totalorder %s4690_s5, %s4523_s16  ;;  %s81_s12 = int_to_ptr.vmem [resolvable:$true] %s80_s12 }
  0x5a   :  { %p4527_p13 = scmp.lt.u32.totalorder %s4523_s16, %s4690_s5 }
  0x5c   :  { %p4529_p0 = pnand %p4527_p13, %p4524_p12 }
  0x5e   :  { %4532 = shalt.err (!%p4529_p0)
}
  0x5f   :  { %s4533_s23 = scalar_lea.vmem %s81_s12, 32  ;;  %p4538_p2 = scmp.lt.s32.totalorder %s81_s12, %s81_s12 }
  0x60   :  { %p4534_p1 = scmp.ne.s32.totalorder %s81_s12, %s4533_s23  ;;  %p4539_p3 = scmp.lt.s32.totalorder %s4533_s23, %s4533_s23 }
  0x62   :  { %p4540_p4 = por %p4539_p3, %p4538_p2 }
  0x64   :  { %p4541_p5 = pnand %p4540_p4, %p4534_p1 }
  0x66   :  { %4544 = shalt.err (!%p4541_p5)
}
  0x67   :  { %83 = dma.hbm_to_vmem [thread:$0]  %s4690_s5, 32, %s81_s12, [#allocation12]  }
  0x68   :  { %4545 = dma.done.wait [#allocation4], 6144  }
  0x69   :  { %4546 = vsyncadd [#allocation4], 4294961152 }
  0x6a   :  { %4547 = dma.done.wait [#allocation6], 48928  }
  0x6b   :  { %4548 = vsyncadd [#allocation6], 4294918368 }
  0x6c   :  { %4549 = dma.done.wait [#allocation9], 4128  }
  0x6d   :  { %4550 = vsyncadd [#allocation9], 4294963168 }
  0x6e   :  { %4551 = dma.done.wait [#allocation12], 32  }
  0x6f   :  { %4552 = vsyncadd [#allocation12], 4294967264  ;;  %v3792_v1 = vld [vmem:[#allocation5 + $0x4] ss:$8 sps:$4 sm:$0xff]   ;;  %v3796_v3 = vld [vmem:[#allocation5] ss:$8 sps:$4 sm:$0xff]  }
  0x70   :  { %v3794_v2 = vld [vmem:[#allocation5 + $0x504] ss:$8 sps:$4 sm:$0xff]   ;;  %2493 = vmatprep.subr.bf16.mxu1 %v3792_v1  ;;  %v3797_v4 = vld [vmem:[#allocation5 + $0x500] ss:$8 sps:$4 sm:$0xff]   ;;  %v3798_v5 = vld [vmem:[#allocation5 + $0x14] ss:$8 sps:$4 sm:$0xff]  }
  0x71   :  { %2708 = vmatprep.subr.bf16.mxu0 %v3794_v2  ;;  %2494 = vmatpush1.bf16.msra.mxu1 %v3796_v3  ;;  %v3800_v6 = vld [vmem:[#allocation5 + $0x514] ss:$8 sps:$4 sm:$0xff]   ;;  %v3802_v7 = vld [vmem:[#allocation5 + $0x10] ss:$8 sps:$4 sm:$0xff]   ;;  %v3804_v9 = vld [vmem:[#allocation5 + $0x24] ss:$8 sps:$4 sm:$0xff]  }
  0x72   :  { %2709 = vmatpush1.bf16.msra.mxu0 %v3797_v4  ;;  %2495 = vmatprep.subr.bf16.mxu1 %v3798_v5  ;;  %v3803_v8 = vld [vmem:[#allocation5 + $0x510] ss:$8 sps:$4 sm:$0xff]   ;;  %v3806_v10 = vld [vmem:[#allocation5 + $0x524] ss:$8 sps:$4 sm:$0xff]   ;;  %v3808_v11 = vld [vmem:[#allocation5 + $0x20] ss:$8 sps:$4 sm:$0xff]  }
  0x73   :  { %2710 = vmatprep.subr.bf16.mxu0 %v3800_v6  ;;  %v3809_v12 = vld [vmem:[#allocation5 + $0x520] ss:$8 sps:$4 sm:$0xff]   ;;  %v3810_v13 = vld [vmem:[#allocation5 + $0x34] ss:$8 sps:$4 sm:$0xff]   ;;  %v3814_v15 = vld [vmem:[#allocation5 + $0x30] ss:$8 sps:$4 sm:$0xff]  }
  0x74   :  { %v3812_v14 = vld [vmem:[#allocation5 + $0x534] ss:$8 sps:$4 sm:$0xff]   ;;  %v3815_v16 = vld [vmem:[#allocation5 + $0x530] ss:$8 sps:$4 sm:$0xff]   ;;  %v3816_v17 = vld [vmem:[#allocation5 + $0x44] ss:$8 sps:$4 sm:$0xff]  }
  0x75   :  { %2496 = vmatpush1.bf16.msra.mxu1 %v3802_v7  ;;  %v3818_v18 = vld [vmem:[#allocation5 + $0x544] ss:$8 sps:$4 sm:$0xff]   ;;  %v3820_v19 = vld [vmem:[#allocation5 + $0x40] ss:$8 sps:$4 sm:$0xff]   ;;  %v3822_v21 = vld [vmem:[#allocation5 + $0x54] ss:$8 sps:$4 sm:$0xff]  }
  0x76   :  { %2711 = vmatpush1.bf16.msra.mxu0 %v3803_v8  ;;  %2497 = vmatprep.subr.bf16.mxu1 %v3804_v9  ;;  %v3821_v20 = vld [vmem:[#allocation5 + $0x540] ss:$8 sps:$4 sm:$0xff]   ;;  %v3824_v22 = vld [vmem:[#allocation5 + $0x554] ss:$8 sps:$4 sm:$0xff]   ;;  %v3826_v23 = vld [vmem:[#allocation5 + $0x50] ss:$8 sps:$4 sm:$0xff]  }
  0x77   :  { %2712 = vmatprep.subr.bf16.mxu0 %v3806_v10  ;;  %v3827_v24 = vld [vmem:[#allocation5 + $0x550] ss:$8 sps:$4 sm:$0xff]   ;;  %v3828_v25 = vld [vmem:[#allocation5 + $0x64] ss:$8 sps:$4 sm:$0xff]   ;;  %v3832_v27 = vld [vmem:[#allocation5 + $0x60] ss:$8 sps:$4 sm:$0xff]  }
  0x78   :  { %v3830_v26 = vld [vmem:[#allocation5 + $0x564] ss:$8 sps:$4 sm:$0xff]   ;;  %v3833_v28 = vld [vmem:[#allocation5 + $0x560] ss:$8 sps:$4 sm:$0xff]   ;;  %v3834_v29 = vld [vmem:[#allocation5 + $0x74] ss:$8 sps:$4 sm:$0xff]  }
  0x79   :  { %2498 = vmatpush1.bf16.msra.mxu1 %v3808_v11  ;;  %v3836_v30 = vld [vmem:[#allocation5 + $0x574] ss:$8 sps:$4 sm:$0xff]   ;;  %v3838_v31 = vld [vmem:[#allocation5 + $0x70] ss:$8 sps:$4 sm:$0xff]   ;;  %v3840_v33 = vld [vmem:[#allocation5 + $0x84] ss:$8 sps:$4 sm:$0xff]  }
  0x7a   :  { %2713 = vmatpush1.bf16.msra.mxu0 %v3809_v12  ;;  %2499 = vmatprep.subr.bf16.mxu1 %v3810_v13  ;;  %v3839_v32 = vld [vmem:[#allocation5 + $0x570] ss:$8 sps:$4 sm:$0xff]   ;;  %v3842_v34 = vld [vmem:[#allocation5 + $0x584] ss:$8 sps:$4 sm:$0xff]   ;;  %v3844_v35 = vld [vmem:[#allocation5 + $0x80] ss:$8 sps:$4 sm:$0xff]  }
  0x7b   :  { %2714 = vmatprep.subr.bf16.mxu0 %v3812_v14  ;;  %v3845_v36 = vld [vmem:[#allocation5 + $0x580] ss:$8 sps:$4 sm:$0xff]   ;;  %v3846_v37 = vld [vmem:[#allocation5 + $0x94] ss:$8 sps:$4 sm:$0xff]   ;;  %v3850_v39 = vld [vmem:[#allocation5 + $0x90] ss:$8 sps:$4 sm:$0xff]  }
  0x7c   :  { %v3848_v38 = vld [vmem:[#allocation5 + $0x594] ss:$8 sps:$4 sm:$0xff]   ;;  %v3851_v40 = vld [vmem:[#allocation5 + $0x590] ss:$8 sps:$4 sm:$0xff]   ;;  %v3852_v41 = vld [vmem:[#allocation5 + $0xa4] ss:$8 sps:$4 sm:$0xff]  }
  0x7d   :  { %2500 = vmatpush1.bf16.msra.mxu1 %v3814_v15  ;;  %v3854_v42 = vld [vmem:[#allocation5 + $0x5a4] ss:$8 sps:$4 sm:$0xff]   ;;  %v3856_v43 = vld [vmem:[#allocation5 + $0xa0] ss:$8 sps:$4 sm:$0xff]   ;;  %v3858_v45 = vld [vmem:[#allocation5 + $0xb4] ss:$8 sps:$4 sm:$0xff]  }
  0x7e   :  { %2715 = vmatpush1.bf16.msra.mxu0 %v3815_v16  ;;  %2501 = vmatprep.subr.bf16.mxu1 %v3816_v17  ;;  %v3857_v44 = vld [vmem:[#allocation5 + $0x5a0] ss:$8 sps:$4 sm:$0xff]   ;;  %v3860_v46 = vld [vmem:[#allocation5 + $0x5b4] ss:$8 sps:$4 sm:$0xff]   ;;  %v3862_v47 = vld [vmem:[#allocation5 + $0xb0] ss:$8 sps:$4 sm:$0xff]  }
  0x7f   :  { %2716 = vmatprep.subr.bf16.mxu0 %v3818_v18  ;;  %v3863_v48 = vld [vmem:[#allocation5 + $0x5b0] ss:$8 sps:$4 sm:$0xff]   ;;  %v106_v49 = vld [vmem:[#allocation3 + $0x8] sm:$0xff]  ;;  %v3870_v59 = vld [vmem:[#allocation5 + $0xd4] ss:$8 sps:$4 sm:$0xff]   ;;  %vm2479_vm0 = vcmask 859136  }
  0x80   :  { %v130_v50 = vld [vmem:[#allocation3 + $0xc8] sm:$0xff]  ;;  %v116_v54 = vld [vmem:[#allocation3 + $0x58] sm:$0xff]  ;;  %v105_v7 = vld [vmem:[#allocation3] sm:$0xff]  ;;  %vm2483_vm1 = vcmask 1043456   ;;  %vm2484_vm2 = vcmask 1044480   ;;  %vm3306_vm3 = vcmask 7168  }
  0x81   :  { %2502 = vmatpush1.bf16.msra.mxu1 %v3820_v19  ;;  %v3864_v51 = vld [vmem:[#allocation5 + $0xc4] ss:$8 sps:$4 sm:$0xff]   ;;  %v154_v53 = vpack.c.bf16 %v130_v50, %v106_v49  ;;  %v140_v55 = vld [vmem:[#allocation3 + $0x118] sm:$0xff]  ;;  %v3868_v57 = vld [vmem:[#allocation5 + $0xc0] ss:$8 sps:$4 sm:$0xff]  }
  0x82   :  { %2717 = vmatpush1.bf16.msra.mxu0 %v3821_v20  ;;  %2503 = vmatprep.subr.bf16.mxu1 %v3822_v21  ;;  %v3866_v52 = vld [vmem:[#allocation5 + $0x5c4] ss:$8 sps:$4 sm:$0xff]   ;;  %v164_v56 = vpack.c.bf16 %v140_v55, %v116_v54  ;;  %v3869_v58 = vld [vmem:[#allocation5 + $0x5c0] ss:$8 sps:$4 sm:$0xff]   ;;  %v3872_v60 = vld [vmem:[#allocation5 + $0x5d4] ss:$8 sps:$4 sm:$0xff]  }
  0x83   :  { %2718 = vmatprep.subr.bf16.mxu0 %v3824_v22  ;;  %2525 = vmatprep.mubr.bf16.mxu1 %v154_v53  ;;  %v3874_v61 = vld [vmem:[#allocation5 + $0xd0] ss:$8 sps:$4 sm:$0xff]   ;;  %v3876_v63 = vld [vmem:[#allocation5 + $0xe4] ss:$8 sps:$4 sm:$0xff]   ;;  %v3880_v1 = vld [vmem:[#allocation5 + $0xe0] ss:$8 sps:$4 sm:$0xff]  }
  0x84   :  { %2740 = vmatprep.mubr.bf16.mxu0 %v164_v56  ;;  %v3875_v62 = vld [vmem:[#allocation5 + $0x5d0] ss:$8 sps:$4 sm:$0xff]   ;;  %v3878_v0 = vld [vmem:[#allocation5 + $0x5e4] ss:$8 sps:$4 sm:$0xff]   ;;  %v3881_v2 = vld [vmem:[#allocation5 + $0x5e0] ss:$8 sps:$4 sm:$0xff]  }
  0x85   :  { %2504 = vmatpush1.bf16.msra.mxu1 %v3826_v23  ;;  %v3882_v3 = vld [vmem:[#allocation5 + $0xf4] ss:$8 sps:$4 sm:$0xff]   ;;  %v3886_v5 = vld [vmem:[#allocation5 + $0xf0] ss:$8 sps:$4 sm:$0xff]   ;;  %v3890_v8 = vld [vmem:[#allocation5 + $0x104] ss:$8 sps:$4 sm:$0xff]  }
  0x86   :  { %2719 = vmatpush1.bf16.msra.mxu0 %v3827_v24  ;;  %2505 = vmatprep.subr.bf16.mxu1 %v3828_v25  ;;  %v3884_v4 = vld [vmem:[#allocation5 + $0x5f4] ss:$8 sps:$4 sm:$0xff]   ;;  %v3887_v6 = vld [vmem:[#allocation5 + $0x5f0] ss:$8 sps:$4 sm:$0xff]   ;;  %v129_v9 = vld [vmem:[#allocation3 + $0xc0] sm:$0xff] }
  0x87   :  { %2720 = vmatprep.subr.bf16.mxu0 %v3830_v26  ;;  %v115_v10 = vld [vmem:[#allocation3 + $0x50] sm:$0xff]  ;;  %v3893_v12 = vld [vmem:[#allocation5 + $0x604] ss:$8 sps:$4 sm:$0xff]   ;;  %v3888_v13 = vld [vmem:[#allocation5 + $0x100] ss:$8 sps:$4 sm:$0xff]   ;;  %v153_v15 = vpack.c.bf16 %v129_v9, %v105_v7 }
  0x88   :  { %v139_v11 = vld [vmem:[#allocation3 + $0x110] sm:$0xff]  ;;  %v3891_v14 = vld [vmem:[#allocation5 + $0x600] ss:$8 sps:$4 sm:$0xff]   ;;  %v3902_v21 = vld [vmem:[#allocation5 + $0x124] ss:$8 sps:$4 sm:$0xff]  }
  0x89   :  { %2506 = vmatpush1.bf16.msra.mxu1 %v3832_v27  ;;  %v163_v16 = vpack.c.bf16 %v139_v11, %v115_v10  ;;  %v3896_v17 = vld [vmem:[#allocation5 + $0x114] ss:$8 sps:$4 sm:$0xff]   ;;  %v3894_v19 = vld [vmem:[#allocation5 + $0x110] ss:$8 sps:$4 sm:$0xff]   ;;  %v3905_v22 = vld [vmem:[#allocation5 + $0x624] ss:$8 sps:$4 sm:$0xff]  }
  0x8a   :  { %2721 = vmatpush1.bf16.msra.mxu0 %v3833_v28  ;;  %2507 = vmatprep.subr.bf16.mxu1 %v3834_v29  ;;  %v3899_v18 = vld [vmem:[#allocation5 + $0x614] ss:$8 sps:$4 sm:$0xff]   ;;  %v3897_v20 = vld [vmem:[#allocation5 + $0x610] ss:$8 sps:$4 sm:$0xff]   ;;  %v3900_v23 = vld [vmem:[#allocation5 + $0x120] ss:$8 sps:$4 sm:$0xff]  }
  0x8b   :  { %2722 = vmatprep.subr.bf16.mxu0 %v3836_v30  ;;  %v3903_v24 = vld [vmem:[#allocation5 + $0x620] ss:$8 sps:$4 sm:$0xff]   ;;  %v3908_v25 = vld [vmem:[#allocation5 + $0x134] ss:$8 sps:$4 sm:$0xff]   ;;  %v3906_v27 = vld [vmem:[#allocation5 + $0x130] ss:$8 sps:$4 sm:$0xff]  }
  0x8c   :  { %v3911_v26 = vld [vmem:[#allocation5 + $0x634] ss:$8 sps:$4 sm:$0xff]   ;;  %v3909_v28 = vld [vmem:[#allocation5 + $0x630] ss:$8 sps:$4 sm:$0xff]   ;;  %v3914_v29 = vld [vmem:[#allocation5 + $0x144] ss:$8 sps:$4 sm:$0xff]  }
  0x8d   :  { %2508 = vmatpush1.bf16.msra.mxu1 %v3838_v31  ;;  %v3917_v30 = vld [vmem:[#allocation5 + $0x644] ss:$8 sps:$4 sm:$0xff]   ;;  %v3912_v31 = vld [vmem:[#allocation5 + $0x140] ss:$8 sps:$4 sm:$0xff]   ;;  %v3930_v49 = vld [vmem:[#allocation5 + $0x170] ss:$8 sps:$4 sm:$0xff]  }
  0x8e   :  { %2723 = vmatpush1.bf16.msra.mxu0 %v3839_v32  ;;  %2509 = vmatprep.subr.bf16.mxu1 %v3840_v33  ;;  %v3915_v32 = vld [vmem:[#allocation5 + $0x640] ss:$8 sps:$4 sm:$0xff]   ;;  %v3920_v33 = vld [vmem:[#allocation5 + $0x154] ss:$8 sps:$4 sm:$0xff]   ;;  %v3933_v50 = vld [vmem:[#allocation5 + $0x670] ss:$8 sps:$4 sm:$0xff]  }
  0x8f   :  { %2724 = vmatprep.subr.bf16.mxu0 %v3842_v34  ;;  %v3923_v34 = vld [vmem:[#allocation5 + $0x654] ss:$8 sps:$4 sm:$0xff]   ;;  %v3936_v53 = vld [vmem:[#allocation5 + $0x180] ss:$8 sps:$4 sm:$0xff]   ;;  %v3966_v9 = vld [vmem:[#allocation5 + $0x1d0] ss:$8 sps:$4 sm:$0xff]  }
  0x90   :  { %v3939_v54 = vld [vmem:[#allocation5 + $0x680] ss:$8 sps:$4 sm:$0xff]   ;;  %v3944_v55 = vld [vmem:[#allocation5 + $0x194] ss:$8 sps:$4 sm:$0xff]   ;;  %v3969_v10 = vld [vmem:[#allocation5 + $0x6d0] ss:$8 sps:$4 sm:$0xff]  }
  0x91   :  { %2510 = vmatpush1.bf16.msra.mxu1 %v3844_v35  ;;  %v3918_v35 = vld [vmem:[#allocation5 + $0x150] ss:$8 sps:$4 sm:$0xff]   ;;  %v3947_v56 = vld [vmem:[#allocation5 + $0x694] ss:$8 sps:$4 sm:$0xff]   ;;  %v3974_v11 = vld [vmem:[#allocation5 + $0x1e4] ss:$8 sps:$4 sm:$0xff]  }
  0x92   :  { %2725 = vmatpush1.bf16.msra.mxu0 %v3845_v36  ;;  %2511 = vmatprep.subr.bf16.mxu1 %v3846_v37  ;;  %v3921_v36 = vld [vmem:[#allocation5 + $0x650] ss:$8 sps:$4 sm:$0xff]   ;;  %v3926_v37 = vld [vmem:[#allocation5 + $0x164] ss:$8 sps:$4 sm:$0xff]   ;;  %v3968_v7 = vld [vmem:[#allocation5 + $0x1d4] ss:$8 sps:$4 sm:$0xff]  }
  0x93   :  { %2726 = vmatprep.subr.bf16.mxu0 %v3848_v38  ;;  %v3929_v38 = vld [vmem:[#allocation5 + $0x664] ss:$8 sps:$4 sm:$0xff]  }
  0x95   :  { %2512 = vmatpush1.bf16.msra.mxu1 %v3850_v39  ;;  %v3924_v39 = vld [vmem:[#allocation5 + $0x160] ss:$8 sps:$4 sm:$0xff]  }
  0x96   :  { %2727 = vmatpush1.bf16.msra.mxu0 %v3851_v40  ;;  %2513 = vmatprep.subr.bf16.mxu1 %v3852_v41  ;;  %v3927_v40 = vld [vmem:[#allocation5 + $0x660] ss:$8 sps:$4 sm:$0xff]   ;;  %v108_v41 = vld [vmem:[#allocation3 + $0x18] sm:$0xff] }
  0x97   :  { %2728 = vmatprep.subr.bf16.mxu0 %v3854_v42  ;;  %v132_v42 = vld [vmem:[#allocation3 + $0xd8] sm:$0xff] }
  0x99   :  { %2514 = vmatpush1.bf16.msra.mxu1 %v3856_v43  ;;  %v3932_v43 = vld [vmem:[#allocation5 + $0x174] ss:$8 sps:$4 sm:$0xff]  }
  0x9a   :  { %2729 = vmatpush1.bf16.msra.mxu0 %v3857_v44  ;;  %2515 = vmatprep.subr.bf16.mxu1 %v3858_v45  ;;  %v3935_v44 = vld [vmem:[#allocation5 + $0x674] ss:$8 sps:$4 sm:$0xff]   ;;  %v156_v45 = vpack.c.bf16 %v132_v42, %v108_v41  ;;  %v3999_v41 = vld [vmem:[#allocation5 + $0x720] ss:$8 sps:$4 sm:$0xff]  }
  0x9b   :  { %2730 = vmatprep.subr.bf16.mxu0 %v3860_v46  ;;  %v118_v46 = vld [vmem:[#allocation3 + $0x68] sm:$0xff] }
  0x9d   :  { %2516 = vmatpush1.bf16.msra.mxu1 %v3862_v47  ;;  %v142_v47 = vld [vmem:[#allocation3 + $0x128] sm:$0xff] }
  0x9e   :  { %2731 = vmatpush1.bf16.msra.mxu0 %v3863_v48  ;;  %2517 = vmatprep.subr.bf16.mxu1 %v3864_v51  ;;  %v166_v48 = vpack.c.bf16 %v142_v47, %v118_v46  ;;  %v3938_v51 = vld [vmem:[#allocation5 + $0x184] ss:$8 sps:$4 sm:$0xff]   ;;  %v4005_v46 = vld [vmem:[#allocation5 + $0x730] ss:$8 sps:$4 sm:$0xff]  }
  0x9f   :  { %2732 = vmatprep.subr.bf16.mxu0 %v3866_v52  ;;  %v3941_v52 = vld [vmem:[#allocation5 + $0x684] ss:$8 sps:$4 sm:$0xff]  }
  0xa0   :  { %v4010_v47 = vld [vmem:[#allocation5 + $0x244] ss:$8 sps:$4 sm:$0xff]  }
  0xa1   :  { %2518 = vmatpush1.bf16.msra.mxu1 %v3868_v57  ;;  %v3942_v57 = vld [vmem:[#allocation5 + $0x190] ss:$8 sps:$4 sm:$0xff]  }
  0xa2   :  { %2733 = vmatpush1.bf16.msra.mxu0 %v3869_v58  ;;  %2519 = vmatprep.subr.bf16.mxu1 %v3870_v59  ;;  %v3945_v58 = vld [vmem:[#allocation5 + $0x690] ss:$8 sps:$4 sm:$0xff]   ;;  %v3950_v59 = vld [vmem:[#allocation5 + $0x1a4] ss:$8 sps:$4 sm:$0xff]  }
  0xa3   :  { %2734 = vmatprep.subr.bf16.mxu0 %v3872_v60  ;;  %v3953_v60 = vld [vmem:[#allocation5 + $0x6a4] ss:$8 sps:$4 sm:$0xff]  }
  0xa5   :  { %2520 = vmatpush1.bf16.msra.mxu1 %v3874_v61  ;;  %v3948_v61 = vld [vmem:[#allocation5 + $0x1a0] ss:$8 sps:$4 sm:$0xff]  }
  0xa6   :  { %2735 = vmatpush1.bf16.msra.mxu0 %v3875_v62  ;;  %2521 = vmatprep.subr.bf16.mxu1 %v3876_v63  ;;  %v3951_v62 = vld [vmem:[#allocation5 + $0x6a0] ss:$8 sps:$4 sm:$0xff]   ;;  %v3956_v63 = vld [vmem:[#allocation5 + $0x1b4] ss:$8 sps:$4 sm:$0xff]  }
  0xa7   :  { %2736 = vmatprep.subr.bf16.mxu0 %v3878_v0  ;;  %v3959_v0 = vld [vmem:[#allocation5 + $0x6b4] ss:$8 sps:$4 sm:$0xff]  }
  0xa9   :  { %2522 = vmatpush1.bf16.msra.mxu1 %v3880_v1  ;;  %v3954_v1 = vld [vmem:[#allocation5 + $0x1b0] ss:$8 sps:$4 sm:$0xff]  }
  0xaa   :  { %2737 = vmatpush1.bf16.msra.mxu0 %v3881_v2  ;;  %2523 = vmatprep.subr.bf16.mxu1 %v3882_v3  ;;  %v3957_v2 = vld [vmem:[#allocation5 + $0x6b0] ss:$8 sps:$4 sm:$0xff]   ;;  %v3962_v3 = vld [vmem:[#allocation5 + $0x1c4] ss:$8 sps:$4 sm:$0xff]  }
  0xab   :  { %2738 = vmatprep.subr.bf16.mxu0 %v3884_v4  ;;  %v3965_v4 = vld [vmem:[#allocation5 + $0x6c4] ss:$8 sps:$4 sm:$0xff]  }
  0xad   :  { %2524 = vmatpush1.bf16.msra.mxu1 %v3886_v5  ;;  %v3960_v5 = vld [vmem:[#allocation5 + $0x1c0] ss:$8 sps:$4 sm:$0xff]  }
  0xae   :  { %2739 = vmatpush1.bf16.msra.mxu0 %v3887_v6  ;;  %2536 = vmatprep.subr.bf16.mxu1 %v3890_v8  ;;  %v3963_v6 = vld [vmem:[#allocation5 + $0x6c0] ss:$8 sps:$4 sm:$0xff]   ;;  %v3971_v8 = vld [vmem:[#allocation5 + $0x6d4] ss:$8 sps:$4 sm:$0xff]  }
  0xaf   :  { %2751 = vmatprep.subr.bf16.mxu0 %v3893_v12  ;;  %v3977_v12 = vld [vmem:[#allocation5 + $0x6e4] ss:$8 sps:$4 sm:$0xff]  }
  0xb0   :  { %2526 = vmatmul.mubr.bf16.vlgmr.msra.gmra.mrb[0].mxu1 %v153_v15  ;;  %v3980_v15 = vld [vmem:[#allocation5 + $0x1f4] ss:$8 sps:$4 sm:$0xff]  }
  0xb1   :  { %2741 = vmatmul.mubr.bf16.vlgmr.msra.gmra.mrb[0].mxu0 %v163_v16  ;;  %2537 = vmatpush1.bf16.msra.mxu1 %v3888_v13  ;;  %v3972_v13 = vld [vmem:[#allocation5 + $0x1e0] ss:$8 sps:$4 sm:$0xff]   ;;  %v3983_v16 = vld [vmem:[#allocation5 + $0x6f4] ss:$8 sps:$4 sm:$0xff]  }
  0xb2   :  { %2752 = vmatpush1.bf16.msra.mxu0 %v3891_v14  ;;  %2538 = vmatprep.subr.bf16.mxu1 %v3896_v17  ;;  %v3975_v14 = vld [vmem:[#allocation5 + $0x6e0] ss:$8 sps:$4 sm:$0xff]   ;;  %v3978_v17 = vld [vmem:[#allocation5 + $0x1f0] ss:$8 sps:$4 sm:$0xff]  }
  0xb3   :  { %2753 = vmatprep.subr.bf16.mxu0 %v3899_v18  ;;  %2568 = vmatprep.mubr.bf16.mxu1 %v156_v45  ;;  %v3981_v18 = vld [vmem:[#allocation5 + $0x6f0] ss:$8 sps:$4 sm:$0xff]  }
  0xb4   :  { %2783 = vmatprep.mubr.bf16.mxu0 %v166_v48  ;;  %v4002_v45 = vld [vmem:[#allocation5 + $0x230] ss:$8 sps:$4 sm:$0xff]   ;;  %v4013_v48 = vld [vmem:[#allocation5 + $0x744] ss:$8 sps:$4 sm:$0xff]  }
  0xb5   :  { %2539 = vmatpush1.bf16.msra.mxu1 %v3894_v19  ;;  %v107_v19 = vld [vmem:[#allocation3 + $0x10] sm:$0xff] }
  0xb6   :  { %2754 = vmatpush1.bf16.msra.mxu0 %v3897_v20  ;;  %2540 = vmatprep.subr.bf16.mxu1 %v3902_v21  ;;  %v3986_v20 = vld [vmem:[#allocation5 + $0x204] ss:$8 sps:$4 sm:$0xff]   ;;  %v131_v21 = vld [vmem:[#allocation3 + $0xd0] sm:$0xff] }
  0xb7   :  { %2755 = vmatprep.subr.bf16.mxu0 %v3905_v22  ;;  %v117_v22 = vld [vmem:[#allocation3 + $0x60] sm:$0xff] }
  0xb9   :  { %2541 = vmatpush1.bf16.msra.mxu1 %v3900_v23  ;;  %v141_v23 = vld [vmem:[#allocation3 + $0x120] sm:$0xff] }
  0xba   :  { %2756 = vmatpush1.bf16.msra.mxu0 %v3903_v24  ;;  %2542 = vmatprep.subr.bf16.mxu1 %v3908_v25  ;;  %v3989_v24 = vld [vmem:[#allocation5 + $0x704] ss:$8 sps:$4 sm:$0xff]   ;;  %v3984_v25 = vld [vmem:[#allocation5 + $0x200] ss:$8 sps:$4 sm:$0xff]  }
  0xbb   :  { %2757 = vmatprep.subr.bf16.mxu0 %v3911_v26  ;;  %v3987_v26 = vld [vmem:[#allocation5 + $0x700] ss:$8 sps:$4 sm:$0xff]  }
  0xbd   :  { %2543 = vmatpush1.bf16.msra.mxu1 %v3906_v27  ;;  %v155_v27 = vpack.c.bf16 %v131_v21, %v107_v19  ;;  %v4064_v19 = vld [vmem:[#allocation5 + $0x2d4] ss:$8 sps:$4 sm:$0xff]   ;;  %v4062_v21 = vld [vmem:[#allocation5 + $0x2d0] ss:$8 sps:$4 sm:$0xff]  }
  0xbe   :  { %2758 = vmatpush1.bf16.msra.mxu0 %v3909_v28  ;;  %2544 = vmatprep.subr.bf16.mxu1 %v3914_v29  ;;  %v165_v28 = vpack.c.bf16 %v141_v23, %v117_v22  ;;  %v3992_v29 = vld [vmem:[#allocation5 + $0x214] ss:$8 sps:$4 sm:$0xff]   ;;  %v4065_v22 = vld [vmem:[#allocation5 + $0x7d0] ss:$8 sps:$4 sm:$0xff]   ;;  %v4070_v23 = vld [vmem:[#allocation5 + $0x2e4] ss:$8 sps:$4 sm:$0xff]  }
  0xbf   :  { %2759 = vmatprep.subr.bf16.mxu0 %v3917_v30  ;;  %v3995_v30 = vld [vmem:[#allocation5 + $0x714] ss:$8 sps:$4 sm:$0xff]  }
  0xc1   :  { %2545 = vmatpush1.bf16.msra.mxu1 %v3912_v31  ;;  %v3990_v31 = vld [vmem:[#allocation5 + $0x210] ss:$8 sps:$4 sm:$0xff]  }
  0xc2   :  { %2760 = vmatpush1.bf16.msra.mxu0 %v3915_v32  ;;  %2546 = vmatprep.subr.bf16.mxu1 %v3920_v33  ;;  %v3993_v32 = vld [vmem:[#allocation5 + $0x710] ss:$8 sps:$4 sm:$0xff]   ;;  %v3998_v33 = vld [vmem:[#allocation5 + $0x224] ss:$8 sps:$4 sm:$0xff]  }
  0xc3   :  { %2761 = vmatprep.subr.bf16.mxu0 %v3923_v34  ;;  %v4001_v34 = vld [vmem:[#allocation5 + $0x724] ss:$8 sps:$4 sm:$0xff]  }
  0xc5   :  { %2547 = vmatpush1.bf16.msra.mxu1 %v3918_v35  ;;  %v110_v35 = vld [vmem:[#allocation3 + $0x28] sm:$0xff] }
  0xc6   :  { %2762 = vmatpush1.bf16.msra.mxu0 %v3921_v36  ;;  %2548 = vmatprep.subr.bf16.mxu1 %v3926_v37  ;;  %v134_v36 = vld [vmem:[#allocation3 + $0xe8] sm:$0xff] }
  0xc7   :  { %2763 = vmatprep.subr.bf16.mxu0 %v3929_v38  ;;  %v158_v37 = vpack.c.bf16 %v134_v36, %v110_v35  ;;  %v3996_v38 = vld [vmem:[#allocation5 + $0x220] ss:$8 sps:$4 sm:$0xff]   ;;  %v143_v35 = vld [vmem:[#allocation3 + $0x130] sm:$0xff]  ;;  %v4085_v36 = vld [vmem:[#allocation5 + $0x804] ss:$8 sps:$4 sm:$0xff]  }
  0xc9   :  { %2549 = vmatpush1.bf16.msra.mxu1 %v3924_v39  ;;  %v120_v39 = vld [vmem:[#allocation3 + $0x78] sm:$0xff] }
  0xca   :  { %2764 = vmatpush1.bf16.msra.mxu0 %v3927_v40  ;;  %2550 = vmatprep.subr.bf16.mxu1 %v3932_v43  ;;  %v144_v40 = vld [vmem:[#allocation3 + $0x138] sm:$0xff] }
  0xcb   :  { %2765 = vmatprep.subr.bf16.mxu0 %v3935_v44  ;;  %v168_v42 = vpack.c.bf16 %v144_v40, %v120_v39  ;;  %v4004_v43 = vld [vmem:[#allocation5 + $0x234] ss:$8 sps:$4 sm:$0xff]  }
  0xcc   :  { %v4007_v44 = vld [vmem:[#allocation5 + $0x734] ss:$8 sps:$4 sm:$0xff]  }
  0xcd   :  { %2551 = vmatpush1.bf16.msra.mxu1 %v3930_v49  ;;  %v4008_v49 = vld [vmem:[#allocation5 + $0x240] ss:$8 sps:$4 sm:$0xff]   ;;  %v112_v39 = vld [vmem:[#allocation3 + $0x38] sm:$0xff] }
  0xce   :  { %2766 = vmatpush1.bf16.msra.mxu0 %v3933_v50  ;;  %2552 = vmatprep.subr.bf16.mxu1 %v3938_v51  ;;  %v4011_v50 = vld [vmem:[#allocation5 + $0x740] ss:$8 sps:$4 sm:$0xff]   ;;  %v4016_v51 = vld [vmem:[#allocation5 + $0x254] ss:$8 sps:$4 sm:$0xff]  }
  0xcf   :  { %2767 = vmatprep.subr.bf16.mxu0 %v3941_v52  ;;  %v4019_v52 = vld [vmem:[#allocation5 + $0x754] ss:$8 sps:$4 sm:$0xff]  }
  0xd0   :  { %v136_v40 = vld [vmem:[#allocation3 + $0xf8] sm:$0xff] }
  0xd1   :  { %2553 = vmatpush1.bf16.msra.mxu1 %v3936_v53  ;;  %v4014_v53 = vld [vmem:[#allocation5 + $0x250] ss:$8 sps:$4 sm:$0xff]  }
  0xd2   :  { %2768 = vmatpush1.bf16.msra.mxu0 %v3939_v54  ;;  %2554 = vmatprep.subr.bf16.mxu1 %v3944_v55  ;;  %v4017_v54 = vld [vmem:[#allocation5 + $0x750] ss:$8 sps:$4 sm:$0xff]   ;;  %v4022_v55 = vld [vmem:[#allocation5 + $0x264] ss:$8 sps:$4 sm:$0xff]  }
  0xd3   :  { %2769 = vmatprep.subr.bf16.mxu0 %v3947_v56  ;;  %v4025_v56 = vld [vmem:[#allocation5 + $0x764] ss:$8 sps:$4 sm:$0xff]  }
  0xd5   :  { %2555 = vmatpush1.bf16.msra.mxu1 %v3942_v57  ;;  %v4020_v57 = vld [vmem:[#allocation5 + $0x260] ss:$8 sps:$4 sm:$0xff]  }
  0xd6   :  { %2770 = vmatpush1.bf16.msra.mxu0 %v3945_v58  ;;  %2556 = vmatprep.subr.bf16.mxu1 %v3950_v59  ;;  %v4023_v58 = vld [vmem:[#allocation5 + $0x760] ss:$8 sps:$4 sm:$0xff]   ;;  %v4028_v59 = vld [vmem:[#allocation5 + $0x274] ss:$8 sps:$4 sm:$0xff]  }
  0xd7   :  { %2771 = vmatprep.subr.bf16.mxu0 %v3953_v60  ;;  %v4031_v60 = vld [vmem:[#allocation5 + $0x774] ss:$8 sps:$4 sm:$0xff]  }
  0xd9   :  { %2557 = vmatpush1.bf16.msra.mxu1 %v3948_v61  ;;  %v4026_v61 = vld [vmem:[#allocation5 + $0x270] ss:$8 sps:$4 sm:$0xff]  }
  0xda   :  { %2772 = vmatpush1.bf16.msra.mxu0 %v3951_v62  ;;  %2558 = vmatprep.subr.bf16.mxu1 %v3956_v63  ;;  %v4029_v62 = vld [vmem:[#allocation5 + $0x770] ss:$8 sps:$4 sm:$0xff]   ;;  %v4034_v63 = vld [vmem:[#allocation5 + $0x284] ss:$8 sps:$4 sm:$0xff]  }
  0xdb   :  { %2773 = vmatprep.subr.bf16.mxu0 %v3959_v0  ;;  %v4037_v0 = vld [vmem:[#allocation5 + $0x784] ss:$8 sps:$4 sm:$0xff]  }
  0xdd   :  { %2559 = vmatpush1.bf16.msra.mxu1 %v3954_v1  ;;  %v4032_v1 = vld [vmem:[#allocation5 + $0x280] ss:$8 sps:$4 sm:$0xff]  }
  0xde   :  { %2774 = vmatpush1.bf16.msra.mxu0 %v3957_v2  ;;  %2560 = vmatprep.subr.bf16.mxu1 %v3962_v3  ;;  %v4035_v2 = vld [vmem:[#allocation5 + $0x780] ss:$8 sps:$4 sm:$0xff]   ;;  %v4040_v3 = vld [vmem:[#allocation5 + $0x294] ss:$8 sps:$4 sm:$0xff]  }
  0xdf   :  { %2775 = vmatprep.subr.bf16.mxu0 %v3965_v4  ;;  %v4043_v4 = vld [vmem:[#allocation5 + $0x794] ss:$8 sps:$4 sm:$0xff]  }
  0xe1   :  { %2561 = vmatpush1.bf16.msra.mxu1 %v3960_v5  ;;  %v4038_v5 = vld [vmem:[#allocation5 + $0x290] ss:$8 sps:$4 sm:$0xff]  }
  0xe2   :  { %2776 = vmatpush1.bf16.msra.mxu0 %v3963_v6  ;;  %2562 = vmatprep.subr.bf16.mxu1 %v3968_v7  ;;  %v4041_v6 = vld [vmem:[#allocation5 + $0x790] ss:$8 sps:$4 sm:$0xff]   ;;  %v4046_v7 = vld [vmem:[#allocation5 + $0x2a4] ss:$8 sps:$4 sm:$0xff]  }
  0xe3   :  { %2777 = vmatprep.subr.bf16.mxu0 %v3971_v8  ;;  %v4049_v8 = vld [vmem:[#allocation5 + $0x7a4] ss:$8 sps:$4 sm:$0xff]  }
  0xe5   :  { %2563 = vmatpush1.bf16.msra.mxu1 %v3966_v9  ;;  %v4044_v9 = vld [vmem:[#allocation5 + $0x2a0] ss:$8 sps:$4 sm:$0xff]  }
  0xe6   :  { %2778 = vmatpush1.bf16.msra.mxu0 %v3969_v10  ;;  %2564 = vmatprep.subr.bf16.mxu1 %v3974_v11  ;;  %v4047_v10 = vld [vmem:[#allocation5 + $0x7a0] ss:$8 sps:$4 sm:$0xff]   ;;  %v4052_v11 = vld [vmem:[#allocation5 + $0x2b4] ss:$8 sps:$4 sm:$0xff]  }
  0xe7   :  { %2779 = vmatprep.subr.bf16.mxu0 %v3977_v12  ;;  %v4055_v12 = vld [vmem:[#allocation5 + $0x7b4] ss:$8 sps:$4 sm:$0xff]  }
  0xe9   :  { %2565 = vmatpush1.bf16.msra.mxu1 %v3972_v13  ;;  %v4050_v13 = vld [vmem:[#allocation5 + $0x2b0] ss:$8 sps:$4 sm:$0xff]  }
  0xea   :  { %2780 = vmatpush1.bf16.msra.mxu0 %v3975_v14  ;;  %2566 = vmatprep.subr.bf16.mxu1 %v3980_v15  ;;  %v4053_v14 = vld [vmem:[#allocation5 + $0x7b0] ss:$8 sps:$4 sm:$0xff]   ;;  %v4058_v15 = vld [vmem:[#allocation5 + $0x2c4] ss:$8 sps:$4 sm:$0xff]  }
  0xeb   :  { %2781 = vmatprep.subr.bf16.mxu0 %v3983_v16  ;;  %v4061_v16 = vld [vmem:[#allocation5 + $0x7c4] ss:$8 sps:$4 sm:$0xff]  }
  0xed   :  { %2567 = vmatpush1.bf16.msra.mxu1 %v3978_v17  ;;  %v4056_v17 = vld [vmem:[#allocation5 + $0x2c0] ss:$8 sps:$4 sm:$0xff]  }
  0xee   :  { %2782 = vmatpush1.bf16.msra.mxu0 %v3981_v18  ;;  %2579 = vmatprep.subr.bf16.mxu1 %v3986_v20  ;;  %v4059_v18 = vld [vmem:[#allocation5 + $0x7c0] ss:$8 sps:$4 sm:$0xff]   ;;  %v4067_v20 = vld [vmem:[#allocation5 + $0x7d4] ss:$8 sps:$4 sm:$0xff]  }
  0xef   :  { %2794 = vmatprep.subr.bf16.mxu0 %v3989_v24  ;;  %v4073_v24 = vld [vmem:[#allocation5 + $0x7e4] ss:$8 sps:$4 sm:$0xff]  }
  0xf0   :  { %2569 = vmatmul.mubr.bf16.vlgmr.msra.gmra.mrb[0].mxu1 %v155_v27  ;;  %v4076_v27 = vld [vmem:[#allocation5 + $0x2f4] ss:$8 sps:$4 sm:$0xff]  }
  0xf1   :  { %2784 = vmatmul.mubr.bf16.vlgmr.msra.gmra.mrb[0].mxu0 %v165_v28  ;;  %2580 = vmatpush1.bf16.msra.mxu1 %v3984_v25  ;;  %v4068_v25 = vld [vmem:[#allocation5 + $0x2e0] ss:$8 sps:$4 sm:$0xff]   ;;  %v4079_v28 = vld [vmem:[#allocation5 + $0x7f4] ss:$8 sps:$4 sm:$0xff]  }
  0xf2   :  { %2795 = vmatpush1.bf16.msra.mxu0 %v3987_v26  ;;  %2581 = vmatprep.subr.bf16.mxu1 %v3992_v29  ;;  %v4071_v26 = vld [vmem:[#allocation5 + $0x7e0] ss:$8 sps:$4 sm:$0xff]   ;;  %v4074_v29 = vld [vmem:[#allocation5 + $0x2f0] ss:$8 sps:$4 sm:$0xff]  }
  0xf3   :  { %2796 = vmatprep.subr.bf16.mxu0 %v3995_v30  ;;  %2611 = vmatprep.mubr.bf16.mxu1 %v158_v37  ;;  %v4077_v30 = vld [vmem:[#allocation5 + $0x7f0] ss:$8 sps:$4 sm:$0xff]   ;;  %v4080_v37 = vld [vmem:[#allocation5 + $0x300] ss:$8 sps:$4 sm:$0xff]  }
  0xf4   :  { %2826 = vmatprep.mubr.bf16.mxu0 %v168_v42 }
  0xf5   :  { %2582 = vmatpush1.bf16.msra.mxu1 %v3990_v31  ;;  %v109_v31 = vld [vmem:[#allocation3 + $0x20] sm:$0xff] }
  0xf6   :  { %2797 = vmatpush1.bf16.msra.mxu0 %v3993_v32  ;;  %2583 = vmatprep.subr.bf16.mxu1 %v3998_v33  ;;  %v4082_v32 = vld [vmem:[#allocation5 + $0x304] ss:$8 sps:$4 sm:$0xff]  }
  0xf7   :  { %2798 = vmatprep.subr.bf16.mxu0 %v4001_v34  ;;  %v133_v33 = vld [vmem:[#allocation3 + $0xe0] sm:$0xff]  ;;  %v119_v34 = vld [vmem:[#allocation3 + $0x70] sm:$0xff] }
  0xf8   :  { %v167_v42 = vpack.c.bf16 %v143_v35, %v119_v34  ;;  %v4161_v34 = vld [vmem:[#allocation5 + $0x8d0] ss:$8 sps:$4 sm:$0xff]   ;;  %v4166_v35 = vld [vmem:[#allocation5 + $0x3e4] ss:$8 sps:$4 sm:$0xff]  }
  0xf9   :  { %2584 = vmatpush1.bf16.msra.mxu1 %v3996_v38  ;;  %v4083_v38 = vld [vmem:[#allocation5 + $0x800] ss:$8 sps:$4 sm:$0xff]  }
  0xfa   :  { %2799 = vmatpush1.bf16.msra.mxu0 %v3999_v41  ;;  %2585 = vmatprep.subr.bf16.mxu1 %v4004_v43  ;;  %v157_v41 = vpack.c.bf16 %v133_v33, %v109_v31  ;;  %v122_v43 = vld [vmem:[#allocation3 + $0x88] sm:$0xff]  ;;  %v4160_v31 = vld [vmem:[#allocation5 + $0x3d4] ss:$8 sps:$4 sm:$0xff]   ;;  %v4158_v33 = vld [vmem:[#allocation5 + $0x3d0] ss:$8 sps:$4 sm:$0xff]  }
  0xfb   :  { %2800 = vmatprep.subr.bf16.mxu0 %v4007_v44  ;;  %v146_v44 = vld [vmem:[#allocation3 + $0x148] sm:$0xff] }
  0xfd   :  { %2586 = vmatpush1.bf16.msra.mxu1 %v4002_v45  ;;  %v4088_v45 = vld [vmem:[#allocation5 + $0x314] ss:$8 sps:$4 sm:$0xff]  }
  0xfe   :  { %2801 = vmatpush1.bf16.msra.mxu0 %v4005_v46  ;;  %2587 = vmatprep.subr.bf16.mxu1 %v4010_v47  ;;  %v4091_v46 = vld [vmem:[#allocation5 + $0x814] ss:$8 sps:$4 sm:$0xff]   ;;  %v160_v47 = vpack.c.bf16 %v136_v40, %v112_v39 }
  0xff   :  { %2802 = vmatprep.subr.bf16.mxu0 %v4013_v48  ;;  %v170_v48 = vpack.c.bf16 %v146_v44, %v122_v43  ;;  %v4172_v39 = vld [vmem:[#allocation5 + $0x3f4] ss:$8 sps:$4 sm:$0xff]  }
 0x100   :  { %v4175_v40 = vld [vmem:[#allocation5 + $0x8f4] ss:$8 sps:$4 sm:$0xff]  }
 0x101   :  { %2588 = vmatpush1.bf16.msra.mxu1 %v4008_v49  ;;  %v4086_v49 = vld [vmem:[#allocation5 + $0x310] ss:$8 sps:$4 sm:$0xff]  }
 0x102   :  { %2803 = vmatpush1.bf16.msra.mxu0 %v4011_v50  ;;  %2589 = vmatprep.subr.bf16.mxu1 %v4016_v51  ;;  %v4089_v50 = vld [vmem:[#allocation5 + $0x810] ss:$8 sps:$4 sm:$0xff]   ;;  %v4094_v51 = vld [vmem:[#allocation5 + $0x324] ss:$8 sps:$4 sm:$0xff]  }
 0x103   :  { %2804 = vmatprep.subr.bf16.mxu0 %v4019_v52  ;;  %v4097_v52 = vld [vmem:[#allocation5 + $0x824] ss:$8 sps:$4 sm:$0xff]   ;;  %v111_v43 = vld [vmem:[#allocation3 + $0x30] sm:$0xff] }
 0x104   :  { %v135_v44 = vld [vmem:[#allocation3 + $0xf0] sm:$0xff] }
 0x105   :  { %2590 = vmatpush1.bf16.msra.mxu1 %v4014_v53  ;;  %v4092_v53 = vld [vmem:[#allocation5 + $0x320] ss:$8 sps:$4 sm:$0xff]  }
 0x106   :  { %2805 = vmatpush1.bf16.msra.mxu0 %v4017_v54  ;;  %2591 = vmatprep.subr.bf16.mxu1 %v4022_v55  ;;  %v4095_v54 = vld [vmem:[#allocation5 + $0x820] ss:$8 sps:$4 sm:$0xff]   ;;  %v4100_v55 = vld [vmem:[#allocation5 + $0x334] ss:$8 sps:$4 sm:$0xff]  }
 0x107   :  { %2806 = vmatprep.subr.bf16.mxu0 %v4025_v56  ;;  %v4103_v56 = vld [vmem:[#allocation5 + $0x834] ss:$8 sps:$4 sm:$0xff]  }
 0x109   :  { %2592 = vmatpush1.bf16.msra.mxu1 %v4020_v57  ;;  %v4098_v57 = vld [vmem:[#allocation5 + $0x330] ss:$8 sps:$4 sm:$0xff]  }
 0x10a   :  { %2807 = vmatpush1.bf16.msra.mxu0 %v4023_v58  ;;  %2593 = vmatprep.subr.bf16.mxu1 %v4028_v59  ;;  %v4101_v58 = vld [vmem:[#allocation5 + $0x830] ss:$8 sps:$4 sm:$0xff]   ;;  %v4106_v59 = vld [vmem:[#allocation5 + $0x344] ss:$8 sps:$4 sm:$0xff]  }
 0x10b   :  { %2808 = vmatprep.subr.bf16.mxu0 %v4031_v60  ;;  %v4109_v60 = vld [vmem:[#allocation5 + $0x844] ss:$8 sps:$4 sm:$0xff]  }
 0x10d   :  { %2594 = vmatpush1.bf16.msra.mxu1 %v4026_v61  ;;  %v4104_v61 = vld [vmem:[#allocation5 + $0x340] ss:$8 sps:$4 sm:$0xff]  }
 0x10e   :  { %2809 = vmatpush1.bf16.msra.mxu0 %v4029_v62  ;;  %2595 = vmatprep.subr.bf16.mxu1 %v4034_v63  ;;  %v4107_v62 = vld [vmem:[#allocation5 + $0x840] ss:$8 sps:$4 sm:$0xff]   ;;  %v4112_v63 = vld [vmem:[#allocation5 + $0x354] ss:$8 sps:$4 sm:$0xff]  }
 0x10f   :  { %2810 = vmatprep.subr.bf16.mxu0 %v4037_v0  ;;  %v4115_v0 = vld [vmem:[#allocation5 + $0x854] ss:$8 sps:$4 sm:$0xff]  }
 0x111   :  { %2596 = vmatpush1.bf16.msra.mxu1 %v4032_v1  ;;  %v4110_v1 = vld [vmem:[#allocation5 + $0x350] ss:$8 sps:$4 sm:$0xff]  }
 0x112   :  { %2811 = vmatpush1.bf16.msra.mxu0 %v4035_v2  ;;  %2597 = vmatprep.subr.bf16.mxu1 %v4040_v3  ;;  %v4113_v2 = vld [vmem:[#allocation5 + $0x850] ss:$8 sps:$4 sm:$0xff]   ;;  %v4118_v3 = vld [vmem:[#allocation5 + $0x364] ss:$8 sps:$4 sm:$0xff]  }
 0x113   :  { %2812 = vmatprep.subr.bf16.mxu0 %v4043_v4  ;;  %v4121_v4 = vld [vmem:[#allocation5 + $0x864] ss:$8 sps:$4 sm:$0xff]  }
 0x115   :  { %2598 = vmatpush1.bf16.msra.mxu1 %v4038_v5  ;;  %v4116_v5 = vld [vmem:[#allocation5 + $0x360] ss:$8 sps:$4 sm:$0xff]  }
 0x116   :  { %2813 = vmatpush1.bf16.msra.mxu0 %v4041_v6  ;;  %2599 = vmatprep.subr.bf16.mxu1 %v4046_v7  ;;  %v4119_v6 = vld [vmem:[#allocation5 + $0x860] ss:$8 sps:$4 sm:$0xff]   ;;  %v4124_v7 = vld [vmem:[#allocation5 + $0x374] ss:$8 sps:$4 sm:$0xff]  }
 0x117   :  { %2814 = vmatprep.subr.bf16.mxu0 %v4049_v8  ;;  %v4127_v8 = vld [vmem:[#allocation5 + $0x874] ss:$8 sps:$4 sm:$0xff]  }
 0x119   :  { %2600 = vmatpush1.bf16.msra.mxu1 %v4044_v9  ;;  %v4122_v9 = vld [vmem:[#allocation5 + $0x370] ss:$8 sps:$4 sm:$0xff]  }
 0x11a   :  { %2815 = vmatpush1.bf16.msra.mxu0 %v4047_v10  ;;  %2601 = vmatprep.subr.bf16.mxu1 %v4052_v11  ;;  %v4125_v10 = vld [vmem:[#allocation5 + $0x870] ss:$8 sps:$4 sm:$0xff]   ;;  %v4130_v11 = vld [vmem:[#allocation5 + $0x384] ss:$8 sps:$4 sm:$0xff]  }
 0x11b   :  { %2816 = vmatprep.subr.bf16.mxu0 %v4055_v12  ;;  %v4133_v12 = vld [vmem:[#allocation5 + $0x884] ss:$8 sps:$4 sm:$0xff]  }
 0x11d   :  { %2602 = vmatpush1.bf16.msra.mxu1 %v4050_v13  ;;  %v4128_v13 = vld [vmem:[#allocation5 + $0x380] ss:$8 sps:$4 sm:$0xff]  }
 0x11e   :  { %2817 = vmatpush1.bf16.msra.mxu0 %v4053_v14  ;;  %2603 = vmatprep.subr.bf16.mxu1 %v4058_v15  ;;  %v4131_v14 = vld [vmem:[#allocation5 + $0x880] ss:$8 sps:$4 sm:$0xff]   ;;  %v4136_v15 = vld [vmem:[#allocation5 + $0x394] ss:$8 sps:$4 sm:$0xff]  }
 0x11f   :  { %2818 = vmatprep.subr.bf16.mxu0 %v4061_v16  ;;  %v4139_v16 = vld [vmem:[#allocation5 + $0x894] ss:$8 sps:$4 sm:$0xff]  }
 0x121   :  { %2604 = vmatpush1.bf16.msra.mxu1 %v4056_v17  ;;  %v4134_v17 = vld [vmem:[#allocation5 + $0x390] ss:$8 sps:$4 sm:$0xff]  }
 0x122   :  { %2819 = vmatpush1.bf16.msra.mxu0 %v4059_v18  ;;  %2605 = vmatprep.subr.bf16.mxu1 %v4064_v19  ;;  %v4137_v18 = vld [vmem:[#allocation5 + $0x890] ss:$8 sps:$4 sm:$0xff]   ;;  %v4142_v19 = vld [vmem:[#allocation5 + $0x3a4] ss:$8 sps:$4 sm:$0xff]  }
 0x123   :  { %2820 = vmatprep.subr.bf16.mxu0 %v4067_v20  ;;  %v4145_v20 = vld [vmem:[#allocation5 + $0x8a4] ss:$8 sps:$4 sm:$0xff]  }
 0x125   :  { %2606 = vmatpush1.bf16.msra.mxu1 %v4062_v21  ;;  %v4140_v21 = vld [vmem:[#allocation5 + $0x3a0] ss:$8 sps:$4 sm:$0xff]  }
 0x126   :  { %2821 = vmatpush1.bf16.msra.mxu0 %v4065_v22  ;;  %2607 = vmatprep.subr.bf16.mxu1 %v4070_v23  ;;  %v4143_v22 = vld [vmem:[#allocation5 + $0x8a0] ss:$8 sps:$4 sm:$0xff]   ;;  %v4148_v23 = vld [vmem:[#allocation5 + $0x3b4] ss:$8 sps:$4 sm:$0xff]  }
 0x127   :  { %2822 = vmatprep.subr.bf16.mxu0 %v4073_v24  ;;  %v4151_v24 = vld [vmem:[#allocation5 + $0x8b4] ss:$8 sps:$4 sm:$0xff]  }
 0x129   :  { %2608 = vmatpush1.bf16.msra.mxu1 %v4068_v25  ;;  %v4146_v25 = vld [vmem:[#allocation5 + $0x3b0] ss:$8 sps:$4 sm:$0xff]  }
 0x12a   :  { %2823 = vmatpush1.bf16.msra.mxu0 %v4071_v26  ;;  %2609 = vmatprep.subr.bf16.mxu1 %v4076_v27  ;;  %v4149_v26 = vld [vmem:[#allocation5 + $0x8b0] ss:$8 sps:$4 sm:$0xff]   ;;  %v4154_v27 = vld [vmem:[#allocation5 + $0x3c4] ss:$8 sps:$4 sm:$0xff]  }
 0x12b   :  { %2824 = vmatprep.subr.bf16.mxu0 %v4079_v28  ;;  %v4157_v28 = vld [vmem:[#allocation5 + $0x8c4] ss:$8 sps:$4 sm:$0xff]  }
 0x12d   :  { %2610 = vmatpush1.bf16.msra.mxu1 %v4074_v29  ;;  %v4152_v29 = vld [vmem:[#allocation5 + $0x3c0] ss:$8 sps:$4 sm:$0xff]  }
 0x12e   :  { %2825 = vmatpush1.bf16.msra.mxu0 %v4077_v30  ;;  %2622 = vmatprep.subr.bf16.mxu1 %v4082_v32  ;;  %v4155_v30 = vld [vmem:[#allocation5 + $0x8c0] ss:$8 sps:$4 sm:$0xff]   ;;  %v4163_v32 = vld [vmem:[#allocation5 + $0x8d4] ss:$8 sps:$4 sm:$0xff]  }
 0x12f   :  { %2837 = vmatprep.subr.bf16.mxu0 %v4085_v36  ;;  %v4169_v36 = vld [vmem:[#allocation5 + $0x8e4] ss:$8 sps:$4 sm:$0xff]  }
 0x130   :  { %2612 = vmatmul.mubr.bf16.vlgmr.msra.gmra.mrb[0].mxu1 %v157_v41  ;;  %v4170_v41 = vld [vmem:[#allocation5 + $0x3f0] ss:$8 sps:$4 sm:$0xff]  }
 0x131   :  { %2827 = vmatmul.mubr.bf16.vlgmr.msra.gmra.mrb[0].mxu0 %v167_v42  ;;  %2623 = vmatpush1.bf16.msra.mxu1 %v4080_v37  ;;  %v4164_v37 = vld [vmem:[#allocation5 + $0x3e0] ss:$8 sps:$4 sm:$0xff]   ;;  %v4173_v42 = vld [vmem:[#allocation5 + $0x8f0] ss:$8 sps:$4 sm:$0xff]  }
 0x132   :  { %2838 = vmatpush1.bf16.msra.mxu0 %v4083_v38  ;;  %2624 = vmatprep.subr.bf16.mxu1 %v4088_v45  ;;  %v4167_v38 = vld [vmem:[#allocation5 + $0x8e0] ss:$8 sps:$4 sm:$0xff]   ;;  %v4178_v45 = vld [vmem:[#allocation5 + $0x404] ss:$8 sps:$4 sm:$0xff]  }
 0x133   :  { %2839 = vmatprep.subr.bf16.mxu0 %v4091_v46  ;;  %2654 = vmatprep.mubr.bf16.mxu1 %v160_v47  ;;  %v4181_v46 = vld [vmem:[#allocation5 + $0x904] ss:$8 sps:$4 sm:$0xff]  }
 0x134   :  { %2869 = vmatprep.mubr.bf16.mxu0 %v170_v48  ;;  %v121_v47 = vld [vmem:[#allocation3 + $0x80] sm:$0xff] }
 0x135   :  { %2625 = vmatpush1.bf16.msra.mxu1 %v4086_v49  ;;  %v145_v48 = vld [vmem:[#allocation3 + $0x140] sm:$0xff]  ;;  %v114_v49 = vld [vmem:[#allocation3 + $0x48] sm:$0xff] }
 0x136   :  { %2840 = vmatpush1.bf16.msra.mxu0 %v4089_v50  ;;  %2626 = vmatprep.subr.bf16.mxu1 %v4094_v51  ;;  %v138_v50 = vld [vmem:[#allocation3 + $0x108] sm:$0xff]  ;;  %v124_v51 = vld [vmem:[#allocation3 + $0x98] sm:$0xff] }
 0x137   :  { %2841 = vmatprep.subr.bf16.mxu0 %v4097_v52  ;;  %v148_v52 = vld [vmem:[#allocation3 + $0x158] sm:$0xff] }
 0x139   :  { %2627 = vmatpush1.bf16.msra.mxu1 %v4092_v53  ;;  %v159_v53 = vpack.c.bf16 %v135_v44, %v111_v43  ;;  %v4256_v43 = vld [vmem:[#allocation5 + $0x4d4] ss:$8 sps:$4 sm:$0xff]  }
 0x13a   :  { %2842 = vmatpush1.bf16.msra.mxu0 %v4095_v54  ;;  %2628 = vmatprep.subr.bf16.mxu1 %v4100_v55  ;;  %v169_v54 = vpack.c.bf16 %v145_v48, %v121_v47  ;;  %v4176_v55 = vld [vmem:[#allocation5 + $0x400] ss:$8 sps:$4 sm:$0xff]   ;;  %v4259_v44 = vld [vmem:[#allocation5 + $0x9d4] ss:$8 sps:$4 sm:$0xff]   ;;  %v4262_v47 = vld [vmem:[#allocation5 + $0x4e4] ss:$8 sps:$4 sm:$0xff]  }
 0x13b   :  { %2843 = vmatprep.subr.bf16.mxu0 %v4103_v56  ;;  %v4179_v56 = vld [vmem:[#allocation5 + $0x900] ss:$8 sps:$4 sm:$0xff]   ;;  %v4265_v48 = vld [vmem:[#allocation5 + $0x9e4] ss:$8 sps:$4 sm:$0xff]  }
 0x13d   :  { %2629 = vmatpush1.bf16.msra.mxu1 %v4098_v57  ;;  %v4184_v57 = vld [vmem:[#allocation5 + $0x414] ss:$8 sps:$4 sm:$0xff]  }
 0x13e   :  { %2844 = vmatpush1.bf16.msra.mxu0 %v4101_v58  ;;  %2630 = vmatprep.subr.bf16.mxu1 %v4106_v59  ;;  %v4187_v58 = vld [vmem:[#allocation5 + $0x914] ss:$8 sps:$4 sm:$0xff]   ;;  %v4182_v59 = vld [vmem:[#allocation5 + $0x410] ss:$8 sps:$4 sm:$0xff]  }
 0x13f   :  { %2845 = vmatprep.subr.bf16.mxu0 %v4109_v60  ;;  %v4185_v60 = vld [vmem:[#allocation5 + $0x910] ss:$8 sps:$4 sm:$0xff]  }
 0x141   :  { %2631 = vmatpush1.bf16.msra.mxu1 %v4104_v61  ;;  %v162_v61 = vpack.c.bf16 %v138_v50, %v114_v49  ;;  %v4260_v49 = vld [vmem:[#allocation5 + $0x4e0] ss:$8 sps:$4 sm:$0xff]  }
 0x142   :  { %2846 = vmatpush1.bf16.msra.mxu0 %v4107_v62  ;;  %2632 = vmatprep.subr.bf16.mxu1 %v4112_v63  ;;  %v172_v62 = vpack.c.bf16 %v148_v52, %v124_v51  ;;  %v4190_v63 = vld [vmem:[#allocation5 + $0x424] ss:$8 sps:$4 sm:$0xff]   ;;  %v4263_v50 = vld [vmem:[#allocation5 + $0x9e0] ss:$8 sps:$4 sm:$0xff]   ;;  %v4268_v51 = vld [vmem:[#allocation5 + $0x4f4] ss:$8 sps:$4 sm:$0xff]  }
 0x143   :  { %2847 = vmatprep.subr.bf16.mxu0 %v4115_v0  ;;  %v4193_v0 = vld [vmem:[#allocation5 + $0x924] ss:$8 sps:$4 sm:$0xff]   ;;  %v4271_v52 = vld [vmem:[#allocation5 + $0x9f4] ss:$8 sps:$4 sm:$0xff]  }
 0x145   :  { %2633 = vmatpush1.bf16.msra.mxu1 %v4110_v1  ;;  %v4188_v1 = vld [vmem:[#allocation5 + $0x420] ss:$8 sps:$4 sm:$0xff]  }
 0x146   :  { %2848 = vmatpush1.bf16.msra.mxu0 %v4113_v2  ;;  %2634 = vmatprep.subr.bf16.mxu1 %v4118_v3  ;;  %v4191_v2 = vld [vmem:[#allocation5 + $0x920] ss:$8 sps:$4 sm:$0xff]   ;;  %v4196_v3 = vld [vmem:[#allocation5 + $0x434] ss:$8 sps:$4 sm:$0xff]  }
 0x147   :  { %2849 = vmatprep.subr.bf16.mxu0 %v4121_v4  ;;  %v4199_v4 = vld [vmem:[#allocation5 + $0x934] ss:$8 sps:$4 sm:$0xff]  }
 0x149   :  { %2635 = vmatpush1.bf16.msra.mxu1 %v4116_v5  ;;  %v4194_v5 = vld [vmem:[#allocation5 + $0x430] ss:$8 sps:$4 sm:$0xff]  }
 0x14a   :  { %2850 = vmatpush1.bf16.msra.mxu0 %v4119_v6  ;;  %2636 = vmatprep.subr.bf16.mxu1 %v4124_v7  ;;  %v4197_v6 = vld [vmem:[#allocation5 + $0x930] ss:$8 sps:$4 sm:$0xff]   ;;  %v4202_v7 = vld [vmem:[#allocation5 + $0x444] ss:$8 sps:$4 sm:$0xff]  }
 0x14b   :  { %2851 = vmatprep.subr.bf16.mxu0 %v4127_v8  ;;  %v4205_v8 = vld [vmem:[#allocation5 + $0x944] ss:$8 sps:$4 sm:$0xff]  }
 0x14d   :  { %2637 = vmatpush1.bf16.msra.mxu1 %v4122_v9  ;;  %v4200_v9 = vld [vmem:[#allocation5 + $0x440] ss:$8 sps:$4 sm:$0xff]  }
 0x14e   :  { %2852 = vmatpush1.bf16.msra.mxu0 %v4125_v10  ;;  %2638 = vmatprep.subr.bf16.mxu1 %v4130_v11  ;;  %v4203_v10 = vld [vmem:[#allocation5 + $0x940] ss:$8 sps:$4 sm:$0xff]   ;;  %v4208_v11 = vld [vmem:[#allocation5 + $0x454] ss:$8 sps:$4 sm:$0xff]  }
 0x14f   :  { %2853 = vmatprep.subr.bf16.mxu0 %v4133_v12  ;;  %v4211_v12 = vld [vmem:[#allocation5 + $0x954] ss:$8 sps:$4 sm:$0xff]  }
 0x151   :  { %2639 = vmatpush1.bf16.msra.mxu1 %v4128_v13  ;;  %v4206_v13 = vld [vmem:[#allocation5 + $0x450] ss:$8 sps:$4 sm:$0xff]  }
 0x152   :  { %2854 = vmatpush1.bf16.msra.mxu0 %v4131_v14  ;;  %2640 = vmatprep.subr.bf16.mxu1 %v4136_v15  ;;  %v4209_v14 = vld [vmem:[#allocation5 + $0x950] ss:$8 sps:$4 sm:$0xff]   ;;  %v4214_v15 = vld [vmem:[#allocation5 + $0x464] ss:$8 sps:$4 sm:$0xff]  }
 0x153   :  { %2855 = vmatprep.subr.bf16.mxu0 %v4139_v16  ;;  %v4217_v16 = vld [vmem:[#allocation5 + $0x964] ss:$8 sps:$4 sm:$0xff]  }
 0x155   :  { %2641 = vmatpush1.bf16.msra.mxu1 %v4134_v17  ;;  %v4212_v17 = vld [vmem:[#allocation5 + $0x460] ss:$8 sps:$4 sm:$0xff]  }
 0x156   :  { %2856 = vmatpush1.bf16.msra.mxu0 %v4137_v18  ;;  %2642 = vmatprep.subr.bf16.mxu1 %v4142_v19  ;;  %v4215_v18 = vld [vmem:[#allocation5 + $0x960] ss:$8 sps:$4 sm:$0xff]   ;;  %v4220_v19 = vld [vmem:[#allocation5 + $0x474] ss:$8 sps:$4 sm:$0xff]  }
 0x157   :  { %2857 = vmatprep.subr.bf16.mxu0 %v4145_v20  ;;  %v4223_v20 = vld [vmem:[#allocation5 + $0x974] ss:$8 sps:$4 sm:$0xff]  }
 0x159   :  { %2643 = vmatpush1.bf16.msra.mxu1 %v4140_v21  ;;  %v4218_v21 = vld [vmem:[#allocation5 + $0x470] ss:$8 sps:$4 sm:$0xff]  }
 0x15a   :  { %2858 = vmatpush1.bf16.msra.mxu0 %v4143_v22  ;;  %2644 = vmatprep.subr.bf16.mxu1 %v4148_v23  ;;  %v4221_v22 = vld [vmem:[#allocation5 + $0x970] ss:$8 sps:$4 sm:$0xff]   ;;  %v4226_v23 = vld [vmem:[#allocation5 + $0x484] ss:$8 sps:$4 sm:$0xff]  }
 0x15b   :  { %2859 = vmatprep.subr.bf16.mxu0 %v4151_v24  ;;  %v4229_v24 = vld [vmem:[#allocation5 + $0x984] ss:$8 sps:$4 sm:$0xff]  }
 0x15d   :  { %2645 = vmatpush1.bf16.msra.mxu1 %v4146_v25  ;;  %v4224_v25 = vld [vmem:[#allocation5 + $0x480] ss:$8 sps:$4 sm:$0xff]  }
 0x15e   :  { %2860 = vmatpush1.bf16.msra.mxu0 %v4149_v26  ;;  %2646 = vmatprep.subr.bf16.mxu1 %v4154_v27  ;;  %v4227_v26 = vld [vmem:[#allocation5 + $0x980] ss:$8 sps:$4 sm:$0xff]   ;;  %v4232_v27 = vld [vmem:[#allocation5 + $0x494] ss:$8 sps:$4 sm:$0xff]  }
 0x15f   :  { %2861 = vmatprep.subr.bf16.mxu0 %v4157_v28  ;;  %v4235_v28 = vld [vmem:[#allocation5 + $0x994] ss:$8 sps:$4 sm:$0xff]  }
 0x161   :  { %2647 = vmatpush1.bf16.msra.mxu1 %v4152_v29  ;;  %v4230_v29 = vld [vmem:[#allocation5 + $0x490] ss:$8 sps:$4 sm:$0xff]  }
 0x162   :  { %2862 = vmatpush1.bf16.msra.mxu0 %v4155_v30  ;;  %2648 = vmatprep.subr.bf16.mxu1 %v4160_v31  ;;  %v4233_v30 = vld [vmem:[#allocation5 + $0x990] ss:$8 sps:$4 sm:$0xff]   ;;  %v4238_v31 = vld [vmem:[#allocation5 + $0x4a4] ss:$8 sps:$4 sm:$0xff]  }
 0x163   :  { %2863 = vmatprep.subr.bf16.mxu0 %v4163_v32  ;;  %v4241_v32 = vld [vmem:[#allocation5 + $0x9a4] ss:$8 sps:$4 sm:$0xff]  }
 0x165   :  { %2649 = vmatpush1.bf16.msra.mxu1 %v4158_v33  ;;  %v4236_v33 = vld [vmem:[#allocation5 + $0x4a0] ss:$8 sps:$4 sm:$0xff]  }
 0x166   :  { %2864 = vmatpush1.bf16.msra.mxu0 %v4161_v34  ;;  %2650 = vmatprep.subr.bf16.mxu1 %v4166_v35  ;;  %v4239_v34 = vld [vmem:[#allocation5 + $0x9a0] ss:$8 sps:$4 sm:$0xff]   ;;  %v4244_v35 = vld [vmem:[#allocation5 + $0x4b4] ss:$8 sps:$4 sm:$0xff]  }
 0x167   :  { %2865 = vmatprep.subr.bf16.mxu0 %v4169_v36  ;;  %v4247_v36 = vld [vmem:[#allocation5 + $0x9b4] ss:$8 sps:$4 sm:$0xff]  }
 0x169   :  { %2651 = vmatpush1.bf16.msra.mxu1 %v4164_v37  ;;  %v4242_v37 = vld [vmem:[#allocation5 + $0x4b0] ss:$8 sps:$4 sm:$0xff]  }
 0x16a   :  { %2866 = vmatpush1.bf16.msra.mxu0 %v4167_v38  ;;  %2652 = vmatprep.subr.bf16.mxu1 %v4172_v39  ;;  %v4245_v38 = vld [vmem:[#allocation5 + $0x9b0] ss:$8 sps:$4 sm:$0xff]   ;;  %v4250_v39 = vld [vmem:[#allocation5 + $0x4c4] ss:$8 sps:$4 sm:$0xff]  }
 0x16b   :  { %2867 = vmatprep.subr.bf16.mxu0 %v4175_v40  ;;  %v4253_v40 = vld [vmem:[#allocation5 + $0x9c4] ss:$8 sps:$4 sm:$0xff]  }
 0x16d   :  { %2653 = vmatpush1.bf16.msra.mxu1 %v4170_v41  ;;  %v4248_v41 = vld [vmem:[#allocation5 + $0x4c0] ss:$8 sps:$4 sm:$0xff]  }
 0x16e   :  { %2868 = vmatpush1.bf16.msra.mxu0 %v4173_v42  ;;  %2665 = vmatprep.subr.bf16.mxu1 %v4178_v45  ;;  %v4251_v42 = vld [vmem:[#allocation5 + $0x9c0] ss:$8 sps:$4 sm:$0xff]   ;;  %v4254_v45 = vld [vmem:[#allocation5 + $0x4d0] ss:$8 sps:$4 sm:$0xff]  }
 0x16f   :  { %2880 = vmatprep.subr.bf16.mxu0 %v4181_v46  ;;  %v4257_v46 = vld [vmem:[#allocation5 + $0x9d0] ss:$8 sps:$4 sm:$0xff]  }
 0x170   :  { %2655 = vmatmul.mubr.bf16.vlgmr.msra.gmra.mrb[0].mxu1 %v159_v53  ;;  %v4266_v53 = vld [vmem:[#allocation5 + $0x4f0] ss:$8 sps:$4 sm:$0xff]  }
 0x171   :  { %2870 = vmatmul.mubr.bf16.vlgmr.msra.gmra.mrb[0].mxu0 %v169_v54  ;;  %2666 = vmatpush1.bf16.msra.mxu1 %v4176_v55  ;;  %v4269_v54 = vld [vmem:[#allocation5 + $0x9f0] ss:$8 sps:$4 sm:$0xff]   ;;  %v113_v55 = vld [vmem:[#allocation3 + $0x40] sm:$0xff] }
 0x172   :  { %2881 = vmatpush1.bf16.msra.mxu0 %v4179_v56  ;;  %2667 = vmatprep.subr.bf16.mxu1 %v4184_v57  ;;  %v137_v56 = vld [vmem:[#allocation3 + $0x100] sm:$0xff]  ;;  %v123_v57 = vld [vmem:[#allocation3 + $0x90] sm:$0xff] }
 0x173   :  { %2882 = vmatprep.subr.bf16.mxu0 %v4187_v58  ;;  %2697 = vmatprep.mubr.bf16.mxu1 %v162_v61  ;;  %v147_v58 = vld [vmem:[#allocation3 + $0x150] sm:$0xff]  ;;  %v150_v61 = vld [vmem:[#allocation3 + $0x168] sm:$0xff] }
 0x174   :  { %2912 = vmatprep.mubr.bf16.mxu0 %v172_v62  ;;  %v161_v62 = vpack.c.bf16 %v137_v56, %v113_v55  ;;  %v4370_v55 = vld [vmem:[#allocation8 + $0x14] ss:$8 sps:$4 sm:$0xff]  }
 0x175   :  { %2668 = vmatpush1.bf16.msra.mxu1 %v4182_v59  ;;  %v4274_v59 = vld [vmem:[#allocation5 + $0xa04] ss:$8 sps:$4 sm:$0xff]   ;;  %v4341_v56 = vld [vmem:[#allocation5 + $0xb70] ss:$8 sps:$4 sm:$0xff]  }
 0x176   :  { %2883 = vmatpush1.bf16.msra.mxu0 %v4185_v60  ;;  %2669 = vmatprep.subr.bf16.mxu1 %v4190_v63  ;;  %v126_v60 = vld [vmem:[#allocation3 + $0xa8] sm:$0xff]  ;;  %v171_v63 = vpack.c.bf16 %v147_v58, %v123_v57 }
 0x177   :  { %2884 = vmatprep.subr.bf16.mxu0 %v4193_v0  ;;  %v4272_v0 = vld [vmem:[#allocation5 + $0xa00] ss:$8 sps:$4 sm:$0xff]   ;;  %v4346_v57 = vld [vmem:[#allocation5 + $0xb84] ss:$8 sps:$4 sm:$0xff]  }
 0x178   :  { %v4368_v58 = vld [vmem:[#allocation8 + $0x10] ss:$8 sps:$4 sm:$0xff]  }
 0x179   :  { %2670 = vmatpush1.bf16.msra.mxu1 %v4188_v1  ;;  %v174_v1 = vpack.c.bf16 %v150_v61, %v126_v60  ;;  %v4344_v60 = vld [vmem:[#allocation5 + $0xb80] ss:$8 sps:$4 sm:$0xff]   ;;  %v4349_v61 = vld [vmem:[#allocation5 + $0xb94] ss:$8 sps:$4 sm:$0xff]  }
 0x17a   :  { %2885 = vmatpush1.bf16.msra.mxu0 %v4191_v2  ;;  %2671 = vmatprep.subr.bf16.mxu1 %v4196_v3  ;;  %v4277_v2 = vld [vmem:[#allocation5 + $0xa14] ss:$8 sps:$4 sm:$0xff]   ;;  %v4275_v3 = vld [vmem:[#allocation5 + $0xa10] ss:$8 sps:$4 sm:$0xff]  }
 0x17b   :  { %2886 = vmatprep.subr.bf16.mxu0 %v4199_v4  ;;  %v4280_v4 = vld [vmem:[#allocation5 + $0xa24] ss:$8 sps:$4 sm:$0xff]  }
 0x17d   :  { %2672 = vmatpush1.bf16.msra.mxu1 %v4194_v5  ;;  %v4278_v5 = vld [vmem:[#allocation5 + $0xa20] ss:$8 sps:$4 sm:$0xff]  }
 0x17e   :  { %2887 = vmatpush1.bf16.msra.mxu0 %v4197_v6  ;;  %2673 = vmatprep.subr.bf16.mxu1 %v4202_v7  ;;  %v4283_v6 = vld [vmem:[#allocation5 + $0xa34] ss:$8 sps:$4 sm:$0xff]   ;;  %v4281_v7 = vld [vmem:[#allocation5 + $0xa30] ss:$8 sps:$4 sm:$0xff]  }
 0x17f   :  { %2888 = vmatprep.subr.bf16.mxu0 %v4205_v8  ;;  %v4286_v8 = vld [vmem:[#allocation5 + $0xa44] ss:$8 sps:$4 sm:$0xff]  }
 0x181   :  { %2674 = vmatpush1.bf16.msra.mxu1 %v4200_v9  ;;  %v4284_v9 = vld [vmem:[#allocation5 + $0xa40] ss:$8 sps:$4 sm:$0xff]  }
 0x182   :  { %2889 = vmatpush1.bf16.msra.mxu0 %v4203_v10  ;;  %2675 = vmatprep.subr.bf16.mxu1 %v4208_v11  ;;  %v4289_v10 = vld [vmem:[#allocation5 + $0xa54] ss:$8 sps:$4 sm:$0xff]   ;;  %v4287_v11 = vld [vmem:[#allocation5 + $0xa50] ss:$8 sps:$4 sm:$0xff]  }
 0x183   :  { %2890 = vmatprep.subr.bf16.mxu0 %v4211_v12  ;;  %v4292_v12 = vld [vmem:[#allocation5 + $0xa64] ss:$8 sps:$4 sm:$0xff]  }
 0x185   :  { %2676 = vmatpush1.bf16.msra.mxu1 %v4206_v13  ;;  %v4290_v13 = vld [vmem:[#allocation5 + $0xa60] ss:$8 sps:$4 sm:$0xff]  }
 0x186   :  { %2891 = vmatpush1.bf16.msra.mxu0 %v4209_v14  ;;  %2677 = vmatprep.subr.bf16.mxu1 %v4214_v15  ;;  %v4295_v14 = vld [vmem:[#allocation5 + $0xa74] ss:$8 sps:$4 sm:$0xff]   ;;  %v4293_v15 = vld [vmem:[#allocation5 + $0xa70] ss:$8 sps:$4 sm:$0xff]  }
 0x187   :  { %2892 = vmatprep.subr.bf16.mxu0 %v4217_v16  ;;  %v4298_v16 = vld [vmem:[#allocation5 + $0xa84] ss:$8 sps:$4 sm:$0xff]  }
 0x189   :  { %2678 = vmatpush1.bf16.msra.mxu1 %v4212_v17  ;;  %v4296_v17 = vld [vmem:[#allocation5 + $0xa80] ss:$8 sps:$4 sm:$0xff]  }
 0x18a   :  { %2893 = vmatpush1.bf16.msra.mxu0 %v4215_v18  ;;  %2679 = vmatprep.subr.bf16.mxu1 %v4220_v19  ;;  %v4301_v18 = vld [vmem:[#allocation5 + $0xa94] ss:$8 sps:$4 sm:$0xff]   ;;  %v4299_v19 = vld [vmem:[#allocation5 + $0xa90] ss:$8 sps:$4 sm:$0xff]  }
 0x18b   :  { %2894 = vmatprep.subr.bf16.mxu0 %v4223_v20  ;;  %v4304_v20 = vld [vmem:[#allocation5 + $0xaa4] ss:$8 sps:$4 sm:$0xff]  }
 0x18d   :  { %2680 = vmatpush1.bf16.msra.mxu1 %v4218_v21  ;;  %v4302_v21 = vld [vmem:[#allocation5 + $0xaa0] ss:$8 sps:$4 sm:$0xff]  }
 0x18e   :  { %2895 = vmatpush1.bf16.msra.mxu0 %v4221_v22  ;;  %2681 = vmatprep.subr.bf16.mxu1 %v4226_v23  ;;  %v4307_v22 = vld [vmem:[#allocation5 + $0xab4] ss:$8 sps:$4 sm:$0xff]   ;;  %v4305_v23 = vld [vmem:[#allocation5 + $0xab0] ss:$8 sps:$4 sm:$0xff]  }
 0x18f   :  { %2896 = vmatprep.subr.bf16.mxu0 %v4229_v24  ;;  %v4310_v24 = vld [vmem:[#allocation5 + $0xac4] ss:$8 sps:$4 sm:$0xff]  }
 0x191   :  { %2682 = vmatpush1.bf16.msra.mxu1 %v4224_v25  ;;  %v4308_v25 = vld [vmem:[#allocation5 + $0xac0] ss:$8 sps:$4 sm:$0xff]  }
 0x192   :  { %2897 = vmatpush1.bf16.msra.mxu0 %v4227_v26  ;;  %2683 = vmatprep.subr.bf16.mxu1 %v4232_v27  ;;  %v4313_v26 = vld [vmem:[#allocation5 + $0xad4] ss:$8 sps:$4 sm:$0xff]   ;;  %v4311_v27 = vld [vmem:[#allocation5 + $0xad0] ss:$8 sps:$4 sm:$0xff]  }
 0x193   :  { %2898 = vmatprep.subr.bf16.mxu0 %v4235_v28  ;;  %v4316_v28 = vld [vmem:[#allocation5 + $0xae4] ss:$8 sps:$4 sm:$0xff]  }
 0x195   :  { %2684 = vmatpush1.bf16.msra.mxu1 %v4230_v29  ;;  %v4314_v29 = vld [vmem:[#allocation5 + $0xae0] ss:$8 sps:$4 sm:$0xff]  }
 0x196   :  { %2899 = vmatpush1.bf16.msra.mxu0 %v4233_v30  ;;  %2685 = vmatprep.subr.bf16.mxu1 %v4238_v31  ;;  %v4319_v30 = vld [vmem:[#allocation5 + $0xaf4] ss:$8 sps:$4 sm:$0xff]   ;;  %v4317_v31 = vld [vmem:[#allocation5 + $0xaf0] ss:$8 sps:$4 sm:$0xff]  }
 0x197   :  { %2900 = vmatprep.subr.bf16.mxu0 %v4241_v32  ;;  %v125_v32 = vld [vmem:[#allocation3 + $0xa0] sm:$0xff] }
 0x199   :  { %2686 = vmatpush1.bf16.msra.mxu1 %v4236_v33  ;;  %v149_v33 = vld [vmem:[#allocation3 + $0x160] sm:$0xff] }
 0x19a   :  { %2901 = vmatpush1.bf16.msra.mxu0 %v4239_v34  ;;  %2687 = vmatprep.subr.bf16.mxu1 %v4244_v35  ;;  %v4322_v34 = vld [vmem:[#allocation5 + $0xb04] ss:$8 sps:$4 sm:$0xff]   ;;  %v128_v35 = vld [vmem:[#allocation3 + $0xb8] sm:$0xff] }
 0x19b   :  { %2902 = vmatprep.subr.bf16.mxu0 %v4247_v36  ;;  %v152_v36 = vld [vmem:[#allocation3 + $0x178] sm:$0xff] }
 0x19d   :  { %2688 = vmatpush1.bf16.msra.mxu1 %v4242_v37  ;;  %v173_v37 = vpack.c.bf16 %v149_v33, %v125_v32  ;;  %v4397_v32 = vld [vmem:[#allocation8 + $0xa4] ss:$8 sps:$4 sm:$0xff]   ;;  %v4395_v33 = vld [vmem:[#allocation8 + $0xa0] ss:$8 sps:$4 sm:$0xff]  }
 0x19e   :  { %2903 = vmatpush1.bf16.msra.mxu0 %v4245_v38  ;;  %2689 = vmatprep.subr.bf16.mxu1 %v4250_v39  ;;  %v4320_v38 = vld [vmem:[#allocation5 + $0xb00] ss:$8 sps:$4 sm:$0xff]   ;;  %v176_v39 = vpack.c.bf16 %v152_v36, %v128_v35 }
 0x19f   :  { %2904 = vmatprep.subr.bf16.mxu0 %v4253_v40  ;;  %v4325_v40 = vld [vmem:[#allocation5 + $0xb14] ss:$8 sps:$4 sm:$0xff]   ;;  %v4398_v35 = vld [vmem:[#allocation8 + $0xb0] ss:$8 sps:$4 sm:$0xff]  }
 0x1a0   :  { %v4403_v36 = vld [vmem:[#allocation8 + $0xc4] ss:$8 sps:$4 sm:$0xff]  }
 0x1a1   :  { %2690 = vmatpush1.bf16.msra.mxu1 %v4248_v41  ;;  %v4323_v41 = vld [vmem:[#allocation5 + $0xb10] ss:$8 sps:$4 sm:$0xff]  }
 0x1a2   :  { %2905 = vmatpush1.bf16.msra.mxu0 %v4251_v42  ;;  %2691 = vmatprep.subr.bf16.mxu1 %v4256_v43  ;;  %v4328_v42 = vld [vmem:[#allocation5 + $0xb24] ss:$8 sps:$4 sm:$0xff]   ;;  %v4326_v43 = vld [vmem:[#allocation5 + $0xb20] ss:$8 sps:$4 sm:$0xff]  }
 0x1a3   :  { %2906 = vmatprep.subr.bf16.mxu0 %v4259_v44  ;;  %v4331_v44 = vld [vmem:[#allocation5 + $0xb34] ss:$8 sps:$4 sm:$0xff]  }
 0x1a5   :  { %2692 = vmatpush1.bf16.msra.mxu1 %v4254_v45  ;;  %v4329_v45 = vld [vmem:[#allocation5 + $0xb30] ss:$8 sps:$4 sm:$0xff]  }
 0x1a6   :  { %2907 = vmatpush1.bf16.msra.mxu0 %v4257_v46  ;;  %2693 = vmatprep.subr.bf16.mxu1 %v4262_v47  ;;  %v4334_v46 = vld [vmem:[#allocation5 + $0xb44] ss:$8 sps:$4 sm:$0xff]   ;;  %v4332_v47 = vld [vmem:[#allocation5 + $0xb40] ss:$8 sps:$4 sm:$0xff]  }
 0x1a7   :  { %2908 = vmatprep.subr.bf16.mxu0 %v4265_v48  ;;  %v4337_v48 = vld [vmem:[#allocation5 + $0xb54] ss:$8 sps:$4 sm:$0xff]  }
 0x1a9   :  { %2694 = vmatpush1.bf16.msra.mxu1 %v4260_v49  ;;  %v4335_v49 = vld [vmem:[#allocation5 + $0xb50] ss:$8 sps:$4 sm:$0xff]  }
 0x1aa   :  { %2909 = vmatpush1.bf16.msra.mxu0 %v4263_v50  ;;  %2695 = vmatprep.subr.bf16.mxu1 %v4268_v51  ;;  %v4340_v50 = vld [vmem:[#allocation5 + $0xb64] ss:$8 sps:$4 sm:$0xff]   ;;  %v4338_v51 = vld [vmem:[#allocation5 + $0xb60] ss:$8 sps:$4 sm:$0xff]  }
 0x1ab   :  { %2910 = vmatprep.subr.bf16.mxu0 %v4271_v52  ;;  %v4343_v52 = vld [vmem:[#allocation5 + $0xb74] ss:$8 sps:$4 sm:$0xff]  }
 0x1ad   :  { %2696 = vmatpush1.bf16.msra.mxu1 %v4266_v53  ;;  %v4365_v53 = vld [vmem:[#allocation8] ss:$8 sps:$4 sm:$0xff]  }
 0x1ae   :  { %2911 = vmatpush1.bf16.msra.mxu0 %v4269_v54  ;;  %v4367_v54 = vld [vmem:[#allocation8 + $0x4] ss:$8 sps:$4 sm:$0xff]  }
 0x1af   :  { %2923 = vmatprep.subr.bf16.mxu0 %v4274_v59  ;;  %3219 = vmatprep.subr.bf16.mxu1 %v4367_v54  ;;  %v4373_v59 = vld [vmem:[#allocation8 + $0x24] ss:$8 sps:$4 sm:$0xff]  }
 0x1b0   :  { %2698 = vmatmul.mubr.bf16.vlgmr.msra.gmra.mrb[0].mxu1 %v161_v62  ;;  %v4371_v62 = vld [vmem:[#allocation8 + $0x20] ss:$8 sps:$4 sm:$0xff]  }
 0x1b1   :  { %2913 = vmatmul.mubr.bf16.vlgmr.msra.gmra.mrb[0].mxu0 %v171_v63  ;;  %3220 = vmatpush1.bf16.msra.mxu1 %v4365_v53  ;;  %v4376_v63 = vld [vmem:[#allocation8 + $0x34] ss:$8 sps:$4 sm:$0xff]  }
 0x1b2   :  { %2924 = vmatpush1.bf16.msra.mxu0 %v4272_v0  ;;  %2955 = vmatprep.mubr.bf16.mxu0 %v174_v1  ;;  %v4347_v0 = vld [vmem:[#allocation5 + $0xb90] ss:$8 sps:$4 sm:$0xff]   ;;  %v4352_v1 = vld [vmem:[#allocation5 + $0xba4] ss:$8 sps:$4 sm:$0xff]  }
 0x1b3   :  { %2925 = vmatprep.subr.bf16.mxu0 %v4277_v2  ;;  %3221 = vmatprep.subr.bf16.mxu1 %v4370_v55  ;;  %v4374_v2 = vld [vmem:[#allocation8 + $0x30] ss:$8 sps:$4 sm:$0xff]  }
 0x1b5   :  { %3222 = vmatpush1.bf16.msra.mxu1 %v4368_v58 }
 0x1b6   :  { %2926 = vmatpush1.bf16.msra.mxu0 %v4275_v3  ;;  %3223 = vmatprep.subr.bf16.mxu1 %v4373_v59  ;;  %v4379_v3 = vld [vmem:[#allocation8 + $0x44] ss:$8 sps:$4 sm:$0xff]  }
 0x1b7   :  { %2927 = vmatprep.subr.bf16.mxu0 %v4280_v4  ;;  %v4350_v4 = vld [vmem:[#allocation5 + $0xba0] ss:$8 sps:$4 sm:$0xff]  }
 0x1b9   :  { %3224 = vmatpush1.bf16.msra.mxu1 %v4371_v62 }
 0x1ba   :  { %2928 = vmatpush1.bf16.msra.mxu0 %v4278_v5  ;;  %3225 = vmatprep.subr.bf16.mxu1 %v4376_v63  ;;  %v4355_v5 = vld [vmem:[#allocation5 + $0xbb4] ss:$8 sps:$4 sm:$0xff]  }
 0x1bb   :  { %2929 = vmatprep.subr.bf16.mxu0 %v4283_v6  ;;  %v4377_v6 = vld [vmem:[#allocation8 + $0x40] ss:$8 sps:$4 sm:$0xff]  }
 0x1bd   :  { %3226 = vmatpush1.bf16.msra.mxu1 %v4374_v2 }
 0x1be   :  { %2930 = vmatpush1.bf16.msra.mxu0 %v4281_v7  ;;  %3227 = vmatprep.subr.bf16.mxu1 %v4379_v3  ;;  %v4382_v7 = vld [vmem:[#allocation8 + $0x54] ss:$8 sps:$4 sm:$0xff]  }
 0x1bf   :  { %2931 = vmatprep.subr.bf16.mxu0 %v4286_v8  ;;  %v4353_v8 = vld [vmem:[#allocation5 + $0xbb0] ss:$8 sps:$4 sm:$0xff]  }
 0x1c1   :  { %3228 = vmatpush1.bf16.msra.mxu1 %v4377_v6 }
 0x1c2   :  { %2932 = vmatpush1.bf16.msra.mxu0 %v4284_v9  ;;  %v4358_v9 = vld [vmem:[#allocation5 + $0xbc4] ss:$8 sps:$4 sm:$0xff]   ;;  %3229 = vmatprep.subr.bf16.mxu1 %v4382_v7 }
 0x1c3   :  { %2933 = vmatprep.subr.bf16.mxu0 %v4289_v10  ;;  %v4380_v10 = vld [vmem:[#allocation8 + $0x50] ss:$8 sps:$4 sm:$0xff]  }
 0x1c5   :  { %3230 = vmatpush1.bf16.msra.mxu1 %v4380_v10 }
 0x1c6   :  { %2934 = vmatpush1.bf16.msra.mxu0 %v4287_v11  ;;  %v4385_v11 = vld [vmem:[#allocation8 + $0x64] ss:$8 sps:$4 sm:$0xff]  }
 0x1c7   :  { %2935 = vmatprep.subr.bf16.mxu0 %v4292_v12  ;;  %v4563_v12 = vmov 65535   ;;  %3231 = vmatprep.subr.bf16.mxu1 %v4385_v11  ;;  %v3047_v11 = vld [vmem:[#allocation10] sm:$0x3] }
 0x1ca   :  { %2936 = vmatpush1.bf16.msra.mxu0 %v4290_v13  ;;  %v2485_v13 = vsel %vm2483_vm1, 4294967295, %v4563_v12 }
 0x1cb   :  { %2937 = vmatprep.subr.bf16.mxu0 %v4295_v14  ;;  %v4356_v14 = vld [vmem:[#allocation5 + $0xbc0] ss:$8 sps:$4 sm:$0xff]  }
 0x1ce   :  { %2938 = vmatpush1.bf16.msra.mxu0 %v4293_v15  ;;  %v4361_v15 = vld [vmem:[#allocation5 + $0xbd4] ss:$8 sps:$4 sm:$0xff]  }
 0x1cf   :  { %2939 = vmatprep.subr.bf16.mxu0 %v4298_v16  ;;  %v4364_v16 = vld [vmem:[#allocation5 + $0xbe4] ss:$8 sps:$4 sm:$0x1f]  }
 0x1d2   :  { %2940 = vmatpush1.bf16.msra.mxu0 %v4296_v17  ;;  %v4383_v17 = vld [vmem:[#allocation8 + $0x60] ss:$8 sps:$4 sm:$0xff]  }
 0x1d3   :  { %2941 = vmatprep.subr.bf16.mxu0 %v4301_v18  ;;  %v2486_v18 = vsel %vm2484_vm2, %v2485_v13, 0  ;;  %3232 = vmatpush1.bf16.msra.mxu1 %v4383_v17 }
 0x1d6   :  { %2942 = vmatpush1.bf16.msra.mxu0 %v4299_v19  ;;  %v4388_v19 = vld [vmem:[#allocation8 + $0x74] ss:$8 sps:$4 sm:$0xff]  }
 0x1d7   :  { %2943 = vmatprep.subr.bf16.mxu0 %v4304_v20  ;;  %v4359_v20 = vld [vmem:[#allocation5 + $0xbd0] ss:$8 sps:$4 sm:$0xff]   ;;  %3233 = vmatprep.subr.bf16.mxu1 %v4388_v19 }
 0x1da   :  { %2944 = vmatpush1.bf16.msra.mxu0 %v4302_v21  ;;  %v4362_v21 = vld [vmem:[#allocation5 + $0xbe0] ss:$8 sps:$4 sm:$0x1f]  }
 0x1db   :  { %2945 = vmatprep.subr.bf16.mxu0 %v4307_v22  ;;  %v2491_v22 = vand.u32 %v4364_v16, %v2486_v18 }
 0x1de   :  { %2946 = vmatpush1.bf16.msra.mxu0 %v4305_v23  ;;  %v4386_v23 = vld [vmem:[#allocation8 + $0x70] ss:$8 sps:$4 sm:$0xff]  }
 0x1df   :  { %2947 = vmatprep.subr.bf16.mxu0 %v4310_v24  ;;  %v4391_v24 = vld [vmem:[#allocation8 + $0x84] ss:$8 sps:$4 sm:$0xff]   ;;  %3234 = vmatpush1.bf16.msra.mxu1 %v4386_v23 }
 0x1e0   :  { %3235 = vmatprep.subr.bf16.mxu1 %v4391_v24 }
 0x1e2   :  { %2948 = vmatpush1.bf16.msra.mxu0 %v4308_v25  ;;  %v2488_v25 = vand.u32 %v4362_v21, %v2486_v18 }
 0x1e3   :  { %2949 = vmatprep.subr.bf16.mxu0 %v4313_v26  ;;  %v127_v26 = vld [vmem:[#allocation3 + $0xb0] sm:$0xff] }
 0x1e6   :  { %2950 = vmatpush1.bf16.msra.mxu0 %v4311_v27  ;;  %v151_v27 = vld [vmem:[#allocation3 + $0x170] sm:$0xff] }
 0x1e7   :  { %2951 = vmatprep.subr.bf16.mxu0 %v4316_v28  ;;  %v4389_v28 = vld [vmem:[#allocation8 + $0x80] ss:$8 sps:$4 sm:$0xff]  }
 0x1e8   :  { %3236 = vmatpush1.bf16.msra.mxu1 %v4389_v28 }
 0x1ea   :  { %2952 = vmatpush1.bf16.msra.mxu0 %v4314_v29  ;;  %v4394_v29 = vld [vmem:[#allocation8 + $0x94] ss:$8 sps:$4 sm:$0xff]  }
 0x1eb   :  { %2953 = vmatprep.subr.bf16.mxu0 %v4319_v30  ;;  %v175_v30 = vpack.c.bf16 %v151_v27, %v127_v26  ;;  %3237 = vmatprep.subr.bf16.mxu1 %v4394_v29 }
 0x1ee   :  { %2954 = vmatpush1.bf16.msra.mxu0 %v4317_v31  ;;  %v4392_v31 = vld [vmem:[#allocation8 + $0x90] ss:$8 sps:$4 sm:$0xff]  }
 0x1ef   :  { %2966 = vmatprep.subr.bf16.mxu0 %v4322_v34  ;;  %3238 = vmatpush1.bf16.msra.mxu1 %v4392_v31  ;;  %v4400_v34 = vld [vmem:[#allocation8 + $0xb4] ss:$8 sps:$4 sm:$0xff]  }
 0x1f0   :  { %3239 = vmatprep.subr.bf16.mxu1 %v4397_v32 }
 0x1f1   :  { %2956 = vmatmul.mubr.bf16.vlgmr.msra.gmra.mrb[0].mxu0 %v173_v37  ;;  %v4401_v37 = vld [vmem:[#allocation8 + $0xc0] ss:$8 sps:$4 sm:$0xff]  }
 0x1f2   :  { %2967 = vmatpush1.bf16.msra.mxu0 %v4320_v38  ;;  %3699 = vmatprep.mubr.msk.bf16.mxu0 %vm2479_vm0, %v176_v39  ;;  %v4406_v38 = vld [vmem:[#allocation8 + $0xd4] ss:$8 sps:$4 sm:$0xff]   ;;  %v4404_v39 = vld [vmem:[#allocation8 + $0xd0] ss:$8 sps:$4 sm:$0xff]  }
 0x1f3   :  { %2968 = vmatprep.subr.bf16.mxu0 %v4325_v40  ;;  %3240 = vmatpush1.bf16.msra.mxu1 %v4395_v33  ;;  %v4409_v40 = vld [vmem:[#allocation8 + $0xe4] ss:$8 sps:$4 sm:$0xff]  }
 0x1f4   :  { %3241 = vmatprep.subr.bf16.mxu1 %v4400_v34 }
 0x1f6   :  { %2969 = vmatpush1.bf16.msra.mxu0 %v4323_v41  ;;  %v4407_v41 = vld [vmem:[#allocation8 + $0xe0] ss:$8 sps:$4 sm:$0xff]  }
 0x1f7   :  { %2970 = vmatprep.subr.bf16.mxu0 %v4328_v42  ;;  %3242 = vmatpush1.bf16.msra.mxu1 %v4398_v35 }
 0x1f8   :  { %3243 = vmatprep.subr.bf16.mxu1 %v4403_v36 }
 0x1fa   :  { %2971 = vmatpush1.bf16.msra.mxu0 %v4326_v43 }
 0x1fb   :  { %2972 = vmatprep.subr.bf16.mxu0 %v4331_v44  ;;  %3244 = vmatpush1.bf16.msra.mxu1 %v4401_v37  ;;  %v4412_v44 = vld [vmem:[#allocation8 + $0xf4] ss:$8 sps:$4 sm:$0xff]   ;;  %v3732_v37 = vld [vmem:[#allocation2] ss:$0 sm:$0xff] }
 0x1fc   :  { %3245 = vmatprep.subr.bf16.mxu1 %v4406_v38 }
 0x1fe   :  { %2973 = vmatpush1.bf16.msra.mxu0 %v4329_v45 }
 0x1ff   :  { %2974 = vmatprep.subr.bf16.mxu0 %v4334_v46  ;;  %3246 = vmatpush1.bf16.msra.mxu1 %v4404_v39  ;;  %v4410_v46 = vld [vmem:[#allocation8 + $0xf0] ss:$8 sps:$4 sm:$0xff]  }
 0x200   :  { %3247 = vmatprep.subr.bf16.mxu1 %v4409_v40 }
 0x202   :  { %2975 = vmatpush1.bf16.msra.mxu0 %v4332_v47 }
 0x203   :  { %2976 = vmatprep.subr.bf16.mxu0 %v4337_v48  ;;  %3248 = vmatpush1.bf16.msra.mxu1 %v4407_v41  ;;  %v561_v48 = vlaneseq }
 0x204   :  { %3249 = vmatprep.subr.bf16.mxu1 %v4412_v44 }
 0x206   :  { %2977 = vmatpush1.bf16.msra.mxu0 %v4335_v49  ;;  %v562_v49 = vshrl.u32 %v561_v48, 7 }
 0x207   :  { %2978 = vmatprep.subr.bf16.mxu0 %v4340_v50  ;;  %3250 = vmatpush1.bf16.msra.mxu1 %v4410_v46 }
 0x208   :  { %v563_v50 = vsub.s32 0, %v562_v49  ;;  %v3275_v12 = vsub.s32 2, %v562_v49 }
 0x20a   :  { %2979 = vmatpush1.bf16.msra.mxu0 %v4338_v51  ;;  %v559_v51 = vld [vmem:[#allocation7] sm:$0x3]  ;;  %v3052_v13 = vrot.slane %v3047_v11, %v563_v50 }
 0x20b   :  { %2980 = vmatprep.subr.bf16.mxu0 %v4343_v52  ;;  %v567_v52 = vsub.s32 1, %v562_v49  ;;  %v564_v53 = vrot.slane %v559_v51, %v563_v50 }
 0x20d   :  { %v568_v54 = vrot.slane %v559_v51, %v567_v52 }
 0x20e   :  { %2981 = vmatpush1.bf16.msra.mxu0 %v4341_v56 }
 0x20f   :  { %2982 = vmatprep.subr.bf16.mxu0 %v4346_v57 }
 0x212   :  { %2983 = vmatpush1.bf16.msra.mxu0 %v4344_v60 }
 0x213   :  { %2984 = vmatprep.subr.bf16.mxu0 %v4349_v61 }
 0x216   :  { %2985 = vmatpush1.bf16.msra.mxu0 %v4347_v0 }
 0x217   :  { %2986 = vmatprep.subr.bf16.mxu0 %v4352_v1 }
 0x21a   :  { %2987 = vmatpush1.bf16.msra.mxu0 %v4350_v4 }
 0x21b   :  { %2988 = vmatprep.subr.bf16.mxu0 %v4355_v5 }
 0x21e   :  { %2989 = vmatpush1.bf16.msra.mxu0 %v4353_v8 }
 0x21f   :  { %2990 = vmatprep.subr.bf16.mxu0 %v4358_v9  ;;  %v3266_v9 = vld [vmem:[#allocation11] sm:$0x3] }
 0x220   :  { %v3267_v10 = vunpack.c.l.bf16 %v3266_v9 }
 0x222   :  { %2991 = vmatpush1.bf16.msra.mxu0 %v4356_v14  ;;  %v3272_v14 = vrot.slane %v3267_v10, %v563_v50  ;;  %v3276_v16 = vrot.slane %v3267_v10, %v3275_v12 }
 0x223   :  { %2992 = vmatprep.subr.bf16.mxu0 %v4361_v15  ;;  %v3056_v15 = vrot.slane %v3047_v11, %v567_v52 }
 0x224   :  { %v3286_v23 = vrot.slane %v3276_v16, %v563_v50 }
 0x226   :  { %2993 = vmatpush1.bf16.msra.mxu0 %v4359_v20  ;;  %v3282_v20 = vrot.slane %v3272_v14, %v563_v50 }
 0x227   :  { %2994 = vmatprep.subr.bf16.mxu0 %v2491_v22 }
 0x22a   :  { %2995 = vmatpush1.bf16.msra.mxu0 %v2488_v25 }
 0x22d   :  { %2999 = vmatmul.mubr.bf16.vlgmr.msra.gmra.mrb[0].mxu0 %v175_v30 }
 0x283   :  { %v2699_v42 = vpop.f32.mrb[0].mxu1 }
 0x284   :  { %v2701_v43 = vpop.f32.mrb[1].mxu1  ;;  %v3733_v55 = vadd.f32 %v2699_v42, %v564_v53 }
 0x285   :  { %v2703_v45 = vpop.f32.mrb[2].mxu1  ;;  %v3735_v56 = vadd.f32 %v2701_v43, %v568_v54 }
 0x286   :  { %v2705_v47 = vpop.f32.mrb[3].mxu1  ;;  %v3737_v58 = vadd.f32 %v2703_v45, %v564_v53 }
 0x287   :  { %v3739_v61 = vadd.f32 %v2705_v47, %v568_v54 }
 0x300   :  { %v3000_v57 = vpop.f32.mrb[0].mxu0 }
 0x301   :  { %v3734_v59 = vadd.f32 %v3733_v55, %v3000_v57  ;;  %v3002_v60 = vpop.f32.mrb[1].mxu0 }
 0x302   :  { %v3736_v62 = vadd.f32 %v3735_v56, %v3002_v60  ;;  %v3004_v63 = vpop.f32.mrb[2].mxu0 }
 0x303   :  { %v3738_v0 = vadd.f32 %v3737_v58, %v3004_v63  ;;  %v3006_v1 = vpop.f32.mrb[3].mxu0  ;;  %v3009_v3 = vmax.f32 %v3734_v59, 0.0 }
 0x304   :  { %v3740_v2 = vadd.f32 %v3739_v61, %v3006_v1  ;;  %v3010_v5 = vmax.f32 %v3736_v62, 0.0 }
 0x305   :  { %v3011_v4 = vmax.f32 %v3738_v0, 0.0 }
 0x306   :  { %v3012_v6 = vmax.f32 %v3740_v2, 0.0 }
 0x307   :  { %v3013_v7 = vpack.c.bf16 %v3011_v4, %v3009_v3 }
 0x308   :  { %v3014_v8 = vpack.c.bf16 %v3012_v6, %v3010_v5 }
 0x30a   :  { %3251 = vmatprep.mubr.bf16.mxu1 %v3014_v8 }
 0x30b   :  { %3252 = vmatmul.mubr.bf16.vlgmr.msra.gmra.mrb[4].mxu1 %v3013_v7 }
 0x3de   :  { %v3253_v17 = vpop.f32.mrb[4].mxu1 }
 0x3df   :  { %v3254_v18 = vadd.f32 %v3253_v17, %v3052_v13  ;;  %v3255_v19 = vpop.f32.mrb[5].mxu1 }
 0x3e0   :  { %v3256_v21 = vadd.f32 %v3255_v19, %v3056_v15  ;;  %v3257_v22 = vpop.f32.mrb[6].mxu1 }
 0x3e1   :  { %v3262_v24 = vmax.f32 %v3254_v18, 0.0  ;;  %v3258_v25 = vadd.f32 %v3257_v22, %v3052_v13  ;;  %v3259_v26 = vpop.f32.mrb[7].mxu1 }
 0x3e2   :  { %v3263_v27 = vmax.f32 %v3256_v21, 0.0  ;;  %v3260_v28 = vadd.f32 %v3259_v26, %v3056_v15 }
 0x3e3   :  { %v3264_v29 = vmax.f32 %v3258_v25, 0.0  ;;  %v3287_v30 = vmul.f32 %v3282_v20, %v3262_v24 }
 0x3e4   :  { %v3265_v31 = vmax.f32 %v3260_v28, 0.0  ;;  %v3288_v32 = vmul.f32 %v3286_v23, %v3263_v27 }
 0x3e5   :  { %v3289_v33 = vmul.f32 %v3282_v20, %v3264_v29 }
 0x3e6   :  { %v3290_v34 = vmul.f32 %v3286_v23, %v3265_v31  ;;  %v3291_v35 = vadd.f32 %v3288_v32, %v3287_v30 }
 0x3e8   :  { %3292 = vadd.xlane.f32.xlu0 %v3291_v35  ;;  %v3294_v36 = vadd.f32 %v3290_v34, %v3289_v33 }
 0x3ec   :  { %3295 = vadd.xlane.f32.xlu0 %v3294_v36 }
 0x475   :  { %v3293_v38 = vpop.xlane.xlu0 %3292 }
 0x476   :  { %v3304_v39 = vadd.f32 %v3732_v37, %v3293_v38 }
 0x478   :  { %3307 = vst.msk [vmem:[%s4692_s7] sm:$0xff] %vm3306_vm3, %v3304_v39 }
 0x479   :  { %v3296_v40 = vpop.xlane.xlu0 %3295 }
 0x47a   :  { %v3305_v41 = vadd.f32 %v3732_v37, %v3296_v40 }
 0x47c   :  { %3308 = vst.msk [vmem:[%s4692_s7 + $0x8] sm:$0xff] %vm3306_vm3, %v3305_v41 }
 0x47d   :  { %3313 = vsyncpa [#allocation4], 1 }
 0x47e   :  { %3314 = vsyncpa [#allocation6], 1 }
 0x47f   :  { %3315 = vsyncpa [#allocation9], 1 }
 0x480   :  { %3316 = vsyncpa [#allocation12], 1 }

</bundles_post_ra>
